<compile_context>
chip_gen: v5e
topology: v5e:2x2
jax: 0.10.0
libtpu: 0.0.40
codegen_flags: <defaults>
</compile_context>

<pallas_src>
import jax
import jax.numpy as jnp
from jax.experimental import pallas as pl
from jax.experimental.pallas import tpu as pltpu

NUM_CLASSES = 10
PADDED_CLASSES = 128          # lane-dense output width
NEG_BIAS = -1e30              # padded-class bias: never the max, exp() == 0


def _round_up(a, m):
    return (a + m - 1) // m * m


def mnist_mlp_kernel(x_ref, w1_ref, b1_ref, w2_ref, b2_ref,
                     w3_ref, b3_ref, w4_ref, b4_ref, o_ref):
    # x tile: (TB, 784) bf16.  Weights bf16, biases f32.  All accumulation f32.
    x = x_ref[...]

    h1 = jnp.dot(x, w1_ref[...], preferred_element_type=jnp.float32) + b1_ref[...]
    h1 = jnp.maximum(h1, 0.0)
    # dropout (p=0.2) -> identity at inference

    h2 = jnp.dot(h1.astype(jnp.bfloat16), w2_ref[...],
                 preferred_element_type=jnp.float32) + b2_ref[...]
    h2 = jnp.maximum(h2, 0.0)

    h3 = jnp.dot(h2.astype(jnp.bfloat16), w3_ref[...],
                 preferred_element_type=jnp.float32) + b3_ref[...]
    h3 = jnp.maximum(h3, 0.0)

    # Last layer is padded to 128 output lanes; padded lanes carry a -1e30 bias,
    # so they never affect max() and contribute exp()==0 to the sum.
    logits = jnp.dot(h3.astype(jnp.bfloat16), w4_ref[...],
                     preferred_element_type=jnp.float32) + b4_ref[...]

    # Numerically stable log_softmax along the class (lane) axis.
    m = jnp.max(logits, axis=-1, keepdims=True)
    shifted = logits - m
    lse = jnp.log(jnp.sum(jnp.exp(shifted), axis=-1, keepdims=True))
    o_ref[...] = (shifted - lse).astype(o_ref.dtype)


@jax.jit
def mnist_net_forward(x_nchw, params):
    w1, b1, w2, b2, w3, b3, w4, b4 = params
    B = x_nchw.shape[0]
    x2d = x_nchw.reshape(B, 28 * 28).astype(jnp.bfloat16)  # same as torch .view(-1, 784)

    # Batch tile: match MXU rows when the batch is big enough; otherwise minimal.
    if B >= 256:
        TB = 256
    elif B >= 128:
        TB = 128
    else:
        TB = _round_up(B, 8)
    Bp = _round_up(B, TB)
    if Bp != B:
        x2d = jnp.pad(x2d, ((0, Bp - B), (0, 0)))

    # bf16 weights for the MXU; f32 biases for the VPU.
    w1b = w1.astype(jnp.bfloat16)
    w2b = w2.astype(jnp.bfloat16)
    w3b = w3.astype(jnp.bfloat16)
    b1f = b1.astype(jnp.float32)
    b2f = b2.astype(jnp.float32)
    b3f = b3.astype(jnp.float32)
    # Pad the final layer to a lane-dense 128-wide output.
    w4p = (jnp.zeros((w4.shape[0], PADDED_CLASSES), jnp.bfloat16)
           .at[:, :NUM_CLASSES].set(w4.astype(jnp.bfloat16)))
    b4p = (jnp.full((1, PADDED_CLASSES), NEG_BIAS, jnp.float32)
           .at[:, :NUM_CLASSES].set(b4.reshape(1, NUM_CLASSES).astype(jnp.float32)))

    grid = (Bp // TB,)

    def resident(shape):
        # Constant index_map: block stays resident in VMEM across all batch tiles.
        return pl.BlockSpec(shape, lambda i: tuple(0 for _ in shape))

    weight_bytes = 2 * (w1b.size + w2b.size + w3b.size + w4p.size)
    bias_bytes = 4 * (b1f.size + b2f.size + b3f.size + b4p.size)
    cost = pl.CostEstimate(
        flops=2 * Bp * (784 * 512 + 512 * 256 + 256 * 128 + 128 * PADDED_CLASSES),
        transcendentals=Bp * (PADDED_CLASSES + 1),  # exp per lane + log per row
        bytes_accessed=(x2d.size * 2 + weight_bytes + bias_bytes
                        + Bp * PADDED_CLASSES * 4),
    )

    out = pl.pallas_call(
        mnist_mlp_kernel,
        out_shape=jax.ShapeDtypeStruct((Bp, PADDED_CLASSES), jnp.float32),
        grid=grid,
        in_specs=[
            pl.BlockSpec((TB, 784), lambda i: (i, 0)),
            resident(w1b.shape), resident(b1f.shape),
            resident(w2b.shape), resident(b2f.shape),
            resident(w3b.shape), resident(b3f.shape),
            resident(w4p.shape), resident(b4p.shape),
        ],
        out_specs=pl.BlockSpec((TB, PADDED_CLASSES), lambda i: (i, 0)),
        compiler_params=pltpu.CompilerParams(dimension_semantics=("parallel",)),
        cost_estimate=cost,
    )(x2d, w1b, b1f, w2b, b2f, w3b, b3f, w4p, b4p)

    # Drop batch padding and padded class lanes.
    return out[:B, :NUM_CLASSES]


def init_params(key):
    """Deterministic init matching nn.Linear shapes (stored as [in, out])."""
    dims = [(784, 512), (512, 256), (256, 128), (128, 10)]
    params = []
    for i, (fan_in, fan_out) in enumerate(dims):
        kw, kb = jax.random.split(jax.random.fold_in(key, i))
        bound = 1.0 / jnp.sqrt(float(fan_in))
        w = jax.random.uniform(kw, (fan_in, fan_out), jnp.float32, -bound, bound)
        # biases kept 2-D (1, out) so kernel refs are >= 2-D
        b = jax.random.uniform(kb, (1, fan_out), jnp.float32, -bound, bound)
        params += [w, b]
    return tuple(params)


def reference_forward(x_nchw, params):
    """Pure-JAX reference with the same bf16-weight / f32-accumulate numerics."""
    w1, b1, w2, b2, w3, b3, w4, b4 = params
    bf = jnp.bfloat16
    x = x_nchw.reshape(x_nchw.shape[0], 784)
    h = jnp.maximum(jnp.dot(x.astype(bf), w1.astype(bf),
                            preferred_element_type=jnp.float32) + b1, 0.0)
    h = jnp.maximum(jnp.dot(h.astype(bf), w2.astype(bf),
                            preferred_element_type=jnp.float32) + b2, 0.0)
    h = jnp.maximum(jnp.dot(h.astype(bf), w3.astype(bf),
                            preferred_element_type=jnp.float32) + b3, 0.0)
    logits = jnp.dot(h.astype(bf), w4.astype(bf),
                     preferred_element_type=jnp.float32) + b4
    return jax.nn.log_softmax(logits, axis=1)


if __name__ == "__main__":
    key = jax.random.PRNGKey(0)
    kx, kp = jax.random.split(key)
    B = 8
    x = jax.random.normal(kx, (B, 1, 28, 28), jnp.float32)  # NCHW, MNIST-like
    params = init_params(kp)

    out = mnist_net_forward(x, params)
    out = jax.block_until_ready(out)

    ref = reference_forward(x, params)
    assert out.shape == (B, NUM_CLASSES)
    assert bool(jnp.all(jnp.isfinite(out))), "non-finite outputs"
    assert jnp.allclose(out, ref, atol=2e-3, rtol=2e-3), "mismatch vs reference"
    print("KERNEL_OK")
</pallas_src>

<mosaic_0001>
module attributes {stable_mosaic.version = 11 : i64} {
  func.func @mnist_mlp_kernel(%arg0: i32, %arg1: memref<8x784xbf16, #tpu.memory_space<vmem>>, %arg2: memref<784x512xbf16, #tpu.memory_space<vmem>>, %arg3: memref<1x512xf32, #tpu.memory_space<vmem>>, %arg4: memref<512x256xbf16, #tpu.memory_space<vmem>>, %arg5: memref<1x256xf32, #tpu.memory_space<vmem>>, %arg6: memref<256x128xbf16, #tpu.memory_space<vmem>>, %arg7: memref<1x128xf32, #tpu.memory_space<vmem>>, %arg8: memref<128x128xbf16, #tpu.memory_space<vmem>>, %arg9: memref<1x128xf32, #tpu.memory_space<vmem>>, %arg10: memref<8x128xf32, #tpu.memory_space<vmem>>) attributes {dimension_semantics = [#tpu.dimension_semantics<parallel>], iteration_bounds = array<i64: 1>, scalar_prefetch = 0 : i64, scratch_operands = 0 : i64, tpu.core_type = #tpu.core_type<tc>, window_params = [{transform_indices = @transform_0, window_bounds = array<i64: 8, 784>}, {pipeline_mode = #tpu.pipeline_mode<synchronous>, transform_indices = @transform_1, window_bounds = array<i64: 784, 512>}, {pipeline_mode = #tpu.pipeline_mode<synchronous>, transform_indices = @transform_2, window_bounds = array<i64: 1, 512>}, {pipeline_mode = #tpu.pipeline_mode<synchronous>, transform_indices = @transform_3, window_bounds = array<i64: 512, 256>}, {pipeline_mode = #tpu.pipeline_mode<synchronous>, transform_indices = @transform_4, window_bounds = array<i64: 1, 256>}, {pipeline_mode = #tpu.pipeline_mode<synchronous>, transform_indices = @transform_5, window_bounds = array<i64: 256, 128>}, {pipeline_mode = #tpu.pipeline_mode<synchronous>, transform_indices = @transform_6, window_bounds = array<i64: 1, 128>}, {pipeline_mode = #tpu.pipeline_mode<synchronous>, transform_indices = @transform_7, window_bounds = array<i64: 128, 128>}, {pipeline_mode = #tpu.pipeline_mode<synchronous>, transform_indices = @transform_8, window_bounds = array<i64: 1, 128>}, {transform_indices = @transform_9, window_bounds = array<i64: 8, 128>}]} {
    %c0 = arith.constant 0 : index
    %c0_0 = arith.constant 0 : index
    %0 = vector.load %arg1[%c0, %c0_0] : memref<8x784xbf16, #tpu.memory_space<vmem>>, vector<8x784xbf16>
    %c0_1 = arith.constant 0 : index
    %c0_2 = arith.constant 0 : index
    %1 = vector.load %arg2[%c0_1, %c0_2] : memref<784x512xbf16, #tpu.memory_space<vmem>>, vector<784x512xbf16>
    %cst = arith.constant dense<0.000000e+00> : vector<8x512xf32>
    %2 = tpu.matmul %0, %1, %cst {dimension_numbers = #tpu.dot_dimension_numbers<[1], [0], [0], [1], [0, 0, 1, 1], [], []>} : vector<8x784xbf16>, vector<784x512xbf16>, vector<8x512xf32> -> vector<8x512xf32>
    %c0_3 = arith.constant 0 : index
    %c0_4 = arith.constant 0 : index
    %3 = vector.load %arg3[%c0_3, %c0_4] : memref<1x512xf32, #tpu.memory_space<vmem>>, vector<1x512xf32>
    %4 = vector.broadcast %3 : vector<1x512xf32> to vector<8x512xf32>
    %5 = arith.addf %2, %4 : vector<8x512xf32>
    %cst_5 = arith.constant 0.000000e+00 : f32
    %6 = vector.broadcast %cst_5 : f32 to vector<8x512xf32>
    %7 = arith.maximumf %5, %6 : vector<8x512xf32>
    %8 = arith.truncf %7 : vector<8x512xf32> to vector<8x512xbf16>
    %c0_6 = arith.constant 0 : index
    %c0_7 = arith.constant 0 : index
    %9 = vector.load %arg4[%c0_6, %c0_7] : memref<512x256xbf16, #tpu.memory_space<vmem>>, vector<512x256xbf16>
    %cst_8 = arith.constant dense<0.000000e+00> : vector<8x256xf32>
    %10 = tpu.matmul %8, %9, %cst_8 {dimension_numbers = #tpu.dot_dimension_numbers<[1], [0], [0], [1], [0, 0, 1, 1], [], []>} : vector<8x512xbf16>, vector<512x256xbf16>, vector<8x256xf32> -> vector<8x256xf32>
    %c0_9 = arith.constant 0 : index
    %c0_10 = arith.constant 0 : index
    %11 = vector.load %arg5[%c0_9, %c0_10] : memref<1x256xf32, #tpu.memory_space<vmem>>, vector<1x256xf32>
    %12 = vector.broadcast %11 : vector<1x256xf32> to vector<8x256xf32>
    %13 = arith.addf %10, %12 : vector<8x256xf32>
    %cst_11 = arith.constant 0.000000e+00 : f32
    %14 = vector.broadcast %cst_11 : f32 to vector<8x256xf32>
    %15 = arith.maximumf %13, %14 : vector<8x256xf32>
    %16 = arith.truncf %15 : vector<8x256xf32> to vector<8x256xbf16>
    %c0_12 = arith.constant 0 : index
    %c0_13 = arith.constant 0 : index
    %17 = vector.load %arg6[%c0_12, %c0_13] : memref<256x128xbf16, #tpu.memory_space<vmem>>, vector<256x128xbf16>
    %cst_14 = arith.constant dense<0.000000e+00> : vector<8x128xf32>
    %18 = tpu.matmul %16, %17, %cst_14 {dimension_numbers = #tpu.dot_dimension_numbers<[1], [0], [0], [1], [0, 0, 1, 1], [], []>} : vector<8x256xbf16>, vector<256x128xbf16>, vector<8x128xf32> -> vector<8x128xf32>
    %c0_15 = arith.constant 0 : index
    %c0_16 = arith.constant 0 : index
    %19 = vector.load %arg7[%c0_15, %c0_16] : memref<1x128xf32, #tpu.memory_space<vmem>>, vector<1x128xf32>
    %20 = vector.broadcast %19 : vector<1x128xf32> to vector<8x128xf32>
    %21 = arith.addf %18, %20 : vector<8x128xf32>
    %cst_17 = arith.constant 0.000000e+00 : f32
    %22 = vector.broadcast %cst_17 : f32 to vector<8x128xf32>
    %23 = arith.maximumf %21, %22 : vector<8x128xf32>
    %24 = arith.truncf %23 : vector<8x128xf32> to vector<8x128xbf16>
    %c0_18 = arith.constant 0 : index
    %c0_19 = arith.constant 0 : index
    %25 = vector.load %arg8[%c0_18, %c0_19] : memref<128x128xbf16, #tpu.memory_space<vmem>>, vector<128x128xbf16>
    %cst_20 = arith.constant dense<0.000000e+00> : vector<8x128xf32>
    %26 = tpu.matmul %24, %25, %cst_20 {dimension_numbers = #tpu.dot_dimension_numbers<[1], [0], [0], [1], [0, 0, 1, 1], [], []>} : vector<8x128xbf16>, vector<128x128xbf16>, vector<8x128xf32> -> vector<8x128xf32>
    %c0_21 = arith.constant 0 : index
    %c0_22 = arith.constant 0 : index
    %27 = vector.load %arg9[%c0_21, %c0_22] : memref<1x128xf32, #tpu.memory_space<vmem>>, vector<1x128xf32>
    %28 = vector.broadcast %27 : vector<1x128xf32> to vector<8x128xf32>
    %29 = arith.addf %26, %28 : vector<8x128xf32>
    %cst_23 = arith.constant dense<0xFF800000> : vector<8xf32>
    %30 = vector.multi_reduction <maximumf>, %29, %cst_23 [1] : vector<8x128xf32> to vector<8xf32>
    %31 = vector.shape_cast %30 : vector<8xf32> to vector<8x1xf32>
    %32 = vector.broadcast %31 : vector<8x1xf32> to vector<8x128xf32>
    %33 = arith.subf %29, %32 : vector<8x128xf32>
    %34 = math.exp %33 : vector<8x128xf32>
    %cst_24 = arith.constant dense<0.000000e+00> : vector<8xf32>
    %35 = vector.multi_reduction <add>, %34, %cst_24 [1] : vector<8x128xf32> to vector<8xf32>
    %36 = vector.shape_cast %35 : vector<8xf32> to vector<8x1xf32>
    %37 = math.log %36 : vector<8x1xf32>
    %38 = vector.broadcast %37 : vector<8x1xf32> to vector<8x128xf32>
    %39 = arith.subf %33, %38 : vector<8x128xf32>
    %c0_25 = arith.constant 0 : index
    %c0_26 = arith.constant 0 : index
    %40 = vector.load %arg10[%c0_25, %c0_26] : memref<8x128xf32, #tpu.memory_space<vmem>>, vector<8x128xf32>
    tpu.vector_store %arg10[%c0_25, %c0_26], %39 {strides = array<i32>} : memref<8x128xf32, #tpu.memory_space<vmem>>, vector<8x128xf32>,
    return
  }
  func.func @transform_0(%arg0: i32) -> (i32, i32) {
    %c0_i32 = arith.constant 0 : i32
    %c0_i32_0 = arith.constant 0 : i32
    return %arg0, %c0_i32 : i32, i32
  }
  func.func @transform_1(%arg0: i32) -> (i32, i32) {
    %c0_i32 = arith.constant 0 : i32
    %c0_i32_0 = arith.constant 0 : i32
    %c0_i32_1 = arith.constant 0 : i32
    return %c0_i32, %c0_i32_0 : i32, i32
  }
  func.func @transform_2(%arg0: i32) -> (i32, i32) {
    %c0_i32 = arith.constant 0 : i32
    %c0_i32_0 = arith.constant 0 : i32
    %c0_i32_1 = arith.constant 0 : i32
    return %c0_i32, %c0_i32_0 : i32, i32
  }
  func.func @transform_3(%arg0: i32) -> (i32, i32) {
    %c0_i32 = arith.constant 0 : i32
    %c0_i32_0 = arith.constant 0 : i32
    %c0_i32_1 = arith.constant 0 : i32
    return %c0_i32, %c0_i32_0 : i32, i32
  }
  func.func @transform_4(%arg0: i32) -> (i32, i32) {
    %c0_i32 = arith.constant 0 : i32
    %c0_i32_0 = arith.constant 0 : i32
    %c0_i32_1 = arith.constant 0 : i32
    return %c0_i32, %c0_i32_0 : i32, i32
  }
  func.func @transform_5(%arg0: i32) -> (i32, i32) {
    %c0_i32 = arith.constant 0 : i32
    %c0_i32_0 = arith.constant 0 : i32
    %c0_i32_1 = arith.constant 0 : i32
    return %c0_i32, %c0_i32_0 : i32, i32
  }
  func.func @transform_6(%arg0: i32) -> (i32, i32) {
    %c0_i32 = arith.constant 0 : i32
    %c0_i32_0 = arith.constant 0 : i32
    %c0_i32_1 = arith.constant 0 : i32
    return %c0_i32, %c0_i32_0 : i32, i32
  }
  func.func @transform_7(%arg0: i32) -> (i32, i32) {
    %c0_i32 = arith.constant 0 : i32
    %c0_i32_0 = arith.constant 0 : i32
    %c0_i32_1 = arith.constant 0 : i32
    return %c0_i32, %c0_i32_0 : i32, i32
  }
  func.func @transform_8(%arg0: i32) -> (i32, i32) {
    %c0_i32 = arith.constant 0 : i32
    %c0_i32_0 = arith.constant 0 : i32
    %c0_i32_1 = arith.constant 0 : i32
    return %c0_i32, %c0_i32_0 : i32, i32
  }
  func.func @transform_9(%arg0: i32) -> (i32, i32) {
    %c0_i32 = arith.constant 0 : i32
    %c0_i32_0 = arith.constant 0 : i32
    return %arg0, %c0_i32 : i32, i32
  }
}

</mosaic_0001>

<bundles_post_ra>
// kernel: mnist_net_forward.1
= control target key start
LH: loop header
LB: loop body
LE: loop exit
PB: predicated region body
PF: predicated region fallthrough
CT: control target
= control target key end

     0   :  { %vm1248_vm0 = vcmask 130048   ;;  %s5628_s0 = inlined_call_operand.vmem [shape: bf16[8,784], index: 0, kind: input, shape index: {}]   ;;  %s5629_s1 = inlined_call_operand.vmem [shape: bf16[784,512], index: 1, kind: input, shape index: {}]   ;;  %s5630_s2 = inlined_call_operand.vmem [shape: f32[1,512], index: 2, kind: input, shape index: {}]   ;;  %s5631_s3 = inlined_call_operand.vmem [shape: bf16[512,256], index: 3, kind: input, shape index: {}]   ;;  %s5632_s4 = inlined_call_operand.vmem [shape: f32[1,256], index: 4, kind: input, shape index: {}]   ;;  %s5633_s5 = inlined_call_operand.vmem [shape: bf16[256,128], index: 5, kind: input, shape index: {}]   ;;  %s5634_s6 = inlined_call_operand.vmem [shape: f32[1,128], index: 6, kind: input, shape index: {}]   ;;  %s5635_s7 = inlined_call_operand.vmem [shape: bf16[128,128], index: 7, kind: input, shape index: {}]   ;;  %s5636_s8 = inlined_call_operand.vmem [shape: f32[1,128], index: 8, kind: input, shape index: {}]   ;;  %s5637_s9 = inlined_call_operand.hbm [shape: f32[8,128], index: 9, kind: output, shape index: {}]  }
   0x1   :  { %v2504_v0 = vld [vmem:[%s5629_s1 + $0xe0] sm:$0xf]  ;;  %v3560_v1 = vld [vmem:[%s5629_s1 + $0xec] sm:$0xf0] }
   0x2   :  { %v2632_v2 = vld [vmem:[%s5629_s1 + $0x1e0] sm:$0xf]  ;;  %v2505_v3 = vor.u32 %v3560_v1, %v2504_v0  ;;  %v3592_v4 = vld [vmem:[%s5629_s1 + $0x1ec] sm:$0xf0] }
   0x3   :  { %v2760_v5 = vld [vmem:[%s5629_s1 + $0x2e0] sm:$0xf]  ;;  %v3624_v6 = vld [vmem:[%s5629_s1 + $0x2ec] sm:$0xf0]  ;;  %v2633_v7 = vor.u32 %v3592_v4, %v2632_v2 }
   0x4   :  { %v2761_v8 = vor.u32 %v3624_v6, %v2760_v5  ;;  %v2888_v9 = vld [vmem:[%s5629_s1 + $0x3e0] sm:$0xf]  ;;  %v3656_v10 = vld [vmem:[%s5629_s1 + $0x3ec] sm:$0xf0]  ;;  %1252 = vmatpush.bf16.msra.mxu0 %v2505_v3 }
   0x5   :  { %v2488_v11 = vld [vmem:[%s5629_s1 + $0xc0] sm:$0xf]  ;;  %v2889_v12 = vor.u32 %v3656_v10, %v2888_v9  ;;  %v3556_v13 = vld [vmem:[%s5629_s1 + $0xcc] sm:$0xf0]  ;;  %1265 = vmatpush.bf16.msra.mxu1 %v2633_v7 }
   0x6   :  { %v2616_v14 = vld [vmem:[%s5629_s1 + $0x1c0] sm:$0xf]  ;;  %v3588_v15 = vld [vmem:[%s5629_s1 + $0x1cc] sm:$0xf0]  ;;  %1278 = vmatpush.bf16.msra.mxu2 %v2761_v8  ;;  %v2489_v16 = vor.u32 %v3556_v13, %v2488_v11 }
   0x7   :  { %v2617_v17 = vor.u32 %v3588_v15, %v2616_v14  ;;  %v2744_v18 = vld [vmem:[%s5629_s1 + $0x2c0] sm:$0xf]  ;;  %v3620_v19 = vld [vmem:[%s5629_s1 + $0x2cc] sm:$0xf0]  ;;  %1291 = vmatpush.bf16.msra.mxu3 %v2889_v12 }
   0x8   :  { %v2872_v20 = vld [vmem:[%s5629_s1 + $0x3c0] sm:$0xf]  ;;  %v2745_v21 = vor.u32 %v3620_v19, %v2744_v18  ;;  %v3652_v22 = vld [vmem:[%s5629_s1 + $0x3cc] sm:$0xf0]  ;;  %1253 = vmatpush.bf16.msra.mxu0 %v2489_v16 }
   0x9   :  { %v2472_v23 = vld [vmem:[%s5629_s1 + $0xa0] sm:$0xf]  ;;  %v3552_v24 = vld [vmem:[%s5629_s1 + $0xac] sm:$0xf0]  ;;  %v2873_v25 = vor.u32 %v3652_v22, %v2872_v20  ;;  %1266 = vmatpush.bf16.msra.mxu1 %v2617_v17 }
   0xa   :  { %v2600_v26 = vld [vmem:[%s5629_s1 + $0x1a0] sm:$0xf]  ;;  %v3584_v27 = vld [vmem:[%s5629_s1 + $0x1ac] sm:$0xf0]  ;;  %v2473_v29 = vor.u32 %v3552_v24, %v2472_v23  ;;  %1279 = vmatpush.bf16.msra.mxu2 %v2745_v21 }
   0xb   :  { %v2728_v28 = vld [vmem:[%s5629_s1 + $0x2a0] sm:$0xf]  ;;  %v3616_v30 = vld [vmem:[%s5629_s1 + $0x2ac] sm:$0xf0]  ;;  %v2601_v33 = vor.u32 %v3584_v27, %v2600_v26  ;;  %1292 = vmatpush.bf16.msra.mxu3 %v2873_v25  ;;  %v35_v25 = vld [vmem:[%s5628_s0 + $0x8] sm:$0xff] }
   0xc   :  { %v2856_v31 = vld [vmem:[%s5629_s1 + $0x3a0] sm:$0xf]  ;;  %v3648_v32 = vld [vmem:[%s5629_s1 + $0x3ac] sm:$0xf0]  ;;  %v2729_v34 = vor.u32 %v3616_v30, %v2728_v28  ;;  %1254 = vmatpush.bf16.msra.mxu0 %v2473_v29 }
   0xd   :  { %v2456_v35 = vld [vmem:[%s5629_s1 + $0x80] sm:$0xf]  ;;  %v3548_v36 = vld [vmem:[%s5629_s1 + $0x8c] sm:$0xf0]  ;;  %v2857_v38 = vor.u32 %v3648_v32, %v2856_v31  ;;  %1267 = vmatpush.bf16.msra.mxu1 %v2601_v33 }
   0xe   :  { %v2584_v37 = vld [vmem:[%s5629_s1 + $0x180] sm:$0xf]  ;;  %v3580_v39 = vld [vmem:[%s5629_s1 + $0x18c] sm:$0xf0]  ;;  %v2457_v44 = vor.u32 %v3548_v36, %v2456_v35  ;;  %1280 = vmatpush.bf16.msra.mxu2 %v2729_v34  ;;  %v3558_v34 = vld [vmem:[%s5629_s1 + $0xe4] sm:$0xf]  ;;  %v250_v36 = vunpack.c.l.b16 %v35_v25 }
   0xf   :  { %v2712_v40 = vld [vmem:[%s5629_s1 + $0x280] sm:$0xf]  ;;  %v3612_v41 = vld [vmem:[%s5629_s1 + $0x28c] sm:$0xf0]  ;;  %v2585_v45 = vor.u32 %v3580_v39, %v2584_v37  ;;  %1293 = vmatpush.bf16.msra.mxu3 %v2857_v38  ;;  %v2506_v35 = vld [vmem:[%s5629_s1 + $0xf0] sm:$0xf0] }
  0x10   :  { %v2840_v42 = vld [vmem:[%s5629_s1 + $0x380] sm:$0xf]  ;;  %v3644_v43 = vld [vmem:[%s5629_s1 + $0x38c] sm:$0xf0]  ;;  %v2713_v46 = vor.u32 %v3612_v41, %v2712_v40  ;;  %1255 = vmatpush.bf16.msra.mxu0 %v2457_v44 }
  0x11   :  { %v2440_v47 = vld [vmem:[%s5629_s1 + $0x60] sm:$0xf]  ;;  %v3544_v48 = vld [vmem:[%s5629_s1 + $0x6c] sm:$0xf0]  ;;  %v2841_v50 = vor.u32 %v3644_v43, %v2840_v42  ;;  %1268 = vmatpush.bf16.msra.mxu1 %v2585_v45  ;;  %v251_v42 = vunpack.c.h.b16 %v35_v25  ;;  %v3578_v25 = vld [vmem:[%s5629_s1 + $0x184] sm:$0xf] }
  0x12   :  { %v2568_v49 = vld [vmem:[%s5629_s1 + $0x160] sm:$0xf]  ;;  %v3576_v51 = vld [vmem:[%s5629_s1 + $0x16c] sm:$0xf0]  ;;  %v2441_v56 = vor.u32 %v3544_v48, %v2440_v47  ;;  %1281 = vmatpush.bf16.msra.mxu2 %v2713_v46  ;;  %v3590_v46 = vld [vmem:[%s5629_s1 + $0x1e4] sm:$0xf] }
  0x13   :  { %v2696_v52 = vld [vmem:[%s5629_s1 + $0x260] sm:$0xf]  ;;  %v3608_v53 = vld [vmem:[%s5629_s1 + $0x26c] sm:$0xf0]  ;;  %v2569_v57 = vor.u32 %v3576_v51, %v2568_v49  ;;  %1294 = vmatpush.bf16.msra.mxu3 %v2841_v50  ;;  %v2634_v47 = vld [vmem:[%s5629_s1 + $0x1f0] sm:$0xf0]  ;;  %v2509_v49 = vor.u32 %v3558_v34, %v2506_v35 }
  0x14   :  { %v2824_v54 = vld [vmem:[%s5629_s1 + $0x360] sm:$0xf]  ;;  %v3640_v55 = vld [vmem:[%s5629_s1 + $0x36c] sm:$0xf0]  ;;  %v2697_v58 = vor.u32 %v3608_v53, %v2696_v52  ;;  %1256 = vmatpush.bf16.msra.mxu0 %v2441_v56  ;;  %v4135_v53 = vpack.c.b16 %v250_v36, %v250_v36  ;;  %v2490_v56 = vld [vmem:[%s5629_s1 + $0xd0] sm:$0xf0] }
  0x15   :  { %v2424_v59 = vld [vmem:[%s5629_s1 + $0x40] sm:$0xf]  ;;  %v3540_v60 = vld [vmem:[%s5629_s1 + $0x4c] sm:$0xf0]  ;;  %v2825_v62 = vor.u32 %v3640_v55, %v2824_v54  ;;  %1269 = vmatpush.bf16.msra.mxu1 %v2569_v57  ;;  %v3554_v55 = vld [vmem:[%s5629_s1 + $0xc4] sm:$0xf] }
  0x16   :  { %v2552_v61 = vld [vmem:[%s5629_s1 + $0x140] sm:$0xf]  ;;  %v3572_v63 = vld [vmem:[%s5629_s1 + $0x14c] sm:$0xf0]  ;;  %v2425_v4 = vor.u32 %v3540_v60, %v2424_v59  ;;  %1282 = vmatpush.bf16.msra.mxu2 %v2697_v58  ;;  %v4148_v60 = vpack.c.b16 %v251_v42, %v251_v42  ;;  %v2442_v34 = vld [vmem:[%s5629_s1 + $0x70] sm:$0xf0] }
  0x17   :  { %v2680_v0 = vld [vmem:[%s5629_s1 + $0x240] sm:$0xf]  ;;  %v3604_v1 = vld [vmem:[%s5629_s1 + $0x24c] sm:$0xf0]  ;;  %v2553_v5 = vor.u32 %v3572_v63, %v2552_v61  ;;  %1295 = vmatpush.bf16.msra.mxu3 %v2825_v62  ;;  %v2637_v61 = vor.u32 %v3590_v46, %v2634_v47  ;;  %v3586_v63 = vld [vmem:[%s5629_s1 + $0x1c4] sm:$0xf] }
  0x18   :  { %v2808_v2 = vld [vmem:[%s5629_s1 + $0x340] sm:$0xf]  ;;  %v3636_v3 = vld [vmem:[%s5629_s1 + $0x34c] sm:$0xf0]  ;;  %v2681_v6 = vor.u32 %v3604_v1, %v2680_v0  ;;  %1257 = vmatpush.bf16.msra.mxu0 %v2425_v4  ;;  %v2618_v0 = vld [vmem:[%s5629_s1 + $0x1d0] sm:$0xf0] }
  0x19   :  { %v2408_v7 = vld [vmem:[%s5629_s1 + $0x20] sm:$0xf]  ;;  %v3536_v8 = vld [vmem:[%s5629_s1 + $0x2c] sm:$0xf0]  ;;  %v2809_v10 = vor.u32 %v3636_v3, %v2808_v2  ;;  %1270 = vmatpush.bf16.msra.mxu1 %v2553_v5  ;;  %v2493_v2 = vor.u32 %v3554_v55, %v2490_v56  ;;  %v3538_v46 = vld [vmem:[%s5629_s1 + $0x44] sm:$0xf] }
  0x1a   :  { %v2536_v9 = vld [vmem:[%s5629_s1 + $0x120] sm:$0xf]  ;;  %v3568_v11 = vld [vmem:[%s5629_s1 + $0x12c] sm:$0xf0]  ;;  %v2409_v17 = vor.u32 %v3536_v8, %v2408_v7  ;;  %1283 = vmatpush.bf16.msra.mxu2 %v2681_v6  ;;  %v3550_v7 = vld [vmem:[%s5629_s1 + $0xa4] sm:$0xf] }
  0x1b   :  { %v2664_v12 = vld [vmem:[%s5629_s1 + $0x220] sm:$0xf]  ;;  %v3600_v13 = vld [vmem:[%s5629_s1 + $0x22c] sm:$0xf0]  ;;  %v2537_v21 = vor.u32 %v3568_v11, %v2536_v9  ;;  %1296 = vmatpush.bf16.msra.mxu3 %v2809_v10  ;;  %v2474_v8 = vld [vmem:[%s5629_s1 + $0xb0] sm:$0xf0]  ;;  %v2621_v10 = vor.u32 %v3586_v63, %v2618_v0 }
  0x1c   :  { %v2792_v14 = vld [vmem:[%s5629_s1 + $0x320] sm:$0xf]  ;;  %v3632_v15 = vld [vmem:[%s5629_s1 + $0x32c] sm:$0xf0]  ;;  %v2665_v22 = vor.u32 %v3600_v13, %v2664_v12  ;;  %1258 = vmatpush.bf16.msra.mxu0 %v2409_v17  ;;  %v3582_v12 = vld [vmem:[%s5629_s1 + $0x1a4] sm:$0xf] }
  0x1d   :  { %v2392_v16 = vld [vmem:[%s5629_s1] sm:$0xf]  ;;  %v3532_v18 = vld [vmem:[%s5629_s1 + $0xc] sm:$0xf0]  ;;  %v2793_v26 = vor.u32 %v3632_v15, %v2792_v14  ;;  %1271 = vmatpush.bf16.msra.mxu1 %v2537_v21  ;;  %v2602_v13 = vld [vmem:[%s5629_s1 + $0x1b0] sm:$0xf0]  ;;  %v2477_v15 = vor.u32 %v3550_v7, %v2474_v8 }
  0x1e   :  { %v2520_v19 = vld [vmem:[%s5629_s1 + $0x100] sm:$0xf]  ;;  %v3564_v20 = vld [vmem:[%s5629_s1 + $0x10c] sm:$0xf0]  ;;  %v2393_v33 = vor.u32 %v3532_v18, %v2392_v16  ;;  %1284 = vmatpush.bf16.msra.mxu2 %v2665_v22  ;;  %v2458_v21 = vld [vmem:[%s5629_s1 + $0x90] sm:$0xf0] }
  0x1f   :  { %v2648_v23 = vld [vmem:[%s5629_s1 + $0x200] sm:$0xf]  ;;  %v3596_v24 = vld [vmem:[%s5629_s1 + $0x20c] sm:$0xf0]  ;;  %v2521_v38 = vor.u32 %v3564_v20, %v2520_v19  ;;  %1297 = vmatpush.bf16.msra.mxu3 %v2793_v26  ;;  %v3546_v20 = vld [vmem:[%s5629_s1 + $0x84] sm:$0xf] }
  0x20   :  { %v2776_v27 = vld [vmem:[%s5629_s1 + $0x300] sm:$0xf]  ;;  %v3628_v28 = vld [vmem:[%s5629_s1 + $0x30c] sm:$0xf0]  ;;  %v2649_v39 = vor.u32 %v3596_v24, %v2648_v23  ;;  %1259 = vmatpush.bf16.msra.mxu0 %v2393_v33  ;;  %v37_v22 = vld [vmem:[%s5628_s0 + $0x18] sm:$0xf]  ;;  %v2605_v23 = vor.u32 %v3582_v12, %v2602_v13 }
  0x21   :  { %v3016_v29 = vld [vmem:[%s5629_s1 + $0x4e0] sm:$0xf]  ;;  %v3688_v30 = vld [vmem:[%s5629_s1 + $0x4ec] sm:$0xf0]  ;;  %v2777_v43 = vor.u32 %v3628_v28, %v2776_v27  ;;  %1272 = vmatpush.bf16.msra.mxu1 %v2521_v38  ;;  %v2586_v26 = vld [vmem:[%s5629_s1 + $0x190] sm:$0xf0]  ;;  %v2461_v28 = vor.u32 %v3546_v20, %v2458_v21  ;;  %v254_v35 = vunpack.c.l.b16 %v37_v22 }
  0x22   :  { %v3144_v31 = vld [vmem:[%s5629_s1 + $0x5e0] sm:$0xf]  ;;  %v3720_v32 = vld [vmem:[%s5629_s1 + $0x5ec] sm:$0xf0]  ;;  %v3017_v44 = vor.u32 %v3688_v30, %v3016_v29  ;;  %1285 = vmatpush.bf16.msra.mxu2 %v2649_v39  ;;  %v3542_v33 = vld [vmem:[%s5629_s1 + $0x64] sm:$0xf]  ;;  %v2589_v36 = vor.u32 %v3578_v25, %v2586_v26 }
  0x23   :  { %v34_v37 = vld [vmem:[%s5628_s0] sm:$0xff]  ;;  %v3724_v45 = vld [vmem:[%s5629_s1 + $0x60c] sm:$0xf0]  ;;  %v3145_v48 = vor.u32 %v3720_v32, %v3144_v31  ;;  %1298 = vmatpush.bf16.msra.mxu3 %v2777_v43  ;;  %v2570_v39 = vld [vmem:[%s5629_s1 + $0x170] sm:$0xf0] }
  0x24   :  { %v3160_v40 = vld [vmem:[%s5629_s1 + $0x600] sm:$0xf]  ;;  %v248_v41 = vunpack.c.l.b16 %v34_v37  ;;  %v3684_v51 = vld [vmem:[%s5629_s1 + $0x4cc] sm:$0xf0]  ;;  %v249_v58 = vunpack.c.h.b16 %v34_v37  ;;  %1304 = vmatpush.bf16.msrb.mxu0 %v3017_v44  ;;  %v3574_v38 = vld [vmem:[%s5629_s1 + $0x164] sm:$0xf] }
  0x25   :  { %v3000_v50 = vld [vmem:[%s5629_s1 + $0x4c0] sm:$0xf]  ;;  %v3716_v54 = vld [vmem:[%s5629_s1 + $0x5cc] sm:$0xf0]  ;;  %v3161_v59 = vor.u32 %v3724_v45, %v3160_v40  ;;  %1317 = vmatpush.bf16.msrb.mxu1 %v3145_v48  ;;  %1286 = vmatmul.bf16.vlgmr.msra.gmra.mxu2 %v4135_v53  ;;  %v2426_v47 = vld [vmem:[%s5629_s1 + $0x50] sm:$0xf0]  ;;  %v4255_v48 = vpack.c.b16 %v254_v35, %v254_v35 }
  0x26   :  { %v3128_v52 = vld [vmem:[%s5629_s1 + $0x5c0] sm:$0xf]  ;;  %v4146_v57 = vpack.c.b16 %v248_v41, %v248_v41  ;;  %v3001_v62 = vor.u32 %v3684_v51, %v3000_v50  ;;  %v3680_v4 = vld [vmem:[%s5629_s1 + $0x4ac] sm:$0xf0]  ;;  %v4176_v9 = vpack.c.b16 %v249_v58, %v249_v58  ;;  %1299 = vmatmul.bf16.vlgmr.msra.gmra.mxu3 %v4148_v60  ;;  %v2445_v41 = vor.u32 %v3542_v33, %v2442_v34  ;;  %v3570_v51 = vld [vmem:[%s5629_s1 + $0x144] sm:$0xf] }
  0x27   :  { %1343 = vmatpush.bf16.msrb.mxu3 %v2509_v49  ;;  %v3129_v1 = vor.u32 %v3716_v54, %v3128_v52  ;;  %v2984_v3 = vld [vmem:[%s5629_s1 + $0x4a0] sm:$0xf]  ;;  %v3712_v6 = vld [vmem:[%s5629_s1 + $0x5ac] sm:$0xf0]  ;;  %1337 = vmatpush.bf16.msrb.mxu2 %v3161_v59  ;;  %v2573_v49 = vor.u32 %v3574_v38, %v2570_v39  ;;  %v2554_v52 = vld [vmem:[%s5629_s1 + $0x150] sm:$0xf0]  ;;  %v2429_v55 = vor.u32 %v3538_v46, %v2426_v47 }
  0x28   :  { %v3112_v5 = vld [vmem:[%s5629_s1 + $0x5a0] sm:$0xf]  ;;  %1260 = vmatmul.bf16.vlgmr.msra.gmra.mxu0 %v4146_v57  ;;  %v2985_v11 = vor.u32 %v3680_v4, %v2984_v3  ;;  %v3676_v17 = vld [vmem:[%s5629_s1 + $0x48c] sm:$0xf0]  ;;  %1273 = vmatmul.bf16.vlgmr.msra.gmra.mxu1 %v4176_v9  ;;  %v2410_v63 = vld [vmem:[%s5629_s1 + $0x30] sm:$0xf0] }
  0x29   :  { %1305 = vmatpush.bf16.msrb.mxu0 %v3001_v62  ;;  %1318 = vmatpush.bf16.msrb.mxu1 %v3129_v1  ;;  %v3113_v14 = vor.u32 %v3712_v6, %v3112_v5  ;;  %v2968_v16 = vld [vmem:[%s5629_s1 + $0x480] sm:$0xf]  ;;  %v3708_v19 = vld [vmem:[%s5629_s1 + $0x58c] sm:$0xf0]  ;;  %v3534_v62 = vld [vmem:[%s5629_s1 + $0x24] sm:$0xf]  ;;  %v2557_v1 = vor.u32 %v3570_v51, %v2554_v52 }
  0x2a   :  { %v3096_v18 = vld [vmem:[%s5629_s1 + $0x580] sm:$0xf]  ;;  %v2969_v24 = vor.u32 %v3676_v17, %v2968_v16  ;;  %v3672_v30 = vld [vmem:[%s5629_s1 + $0x46c] sm:$0xf0]  ;;  %v3566_v0 = vld [vmem:[%s5629_s1 + $0x124] sm:$0xf]  ;;  %v2413_v7 = vor.u32 %v3534_v62, %v2410_v63 }
  0x2b   :  { %1356 = vmatpush.bf16.msra.mxu2 %v2637_v61  ;;  %1344 = vmatpush.bf16.msrb.mxu3 %v2493_v2  ;;  %v3097_v27 = vor.u32 %v3708_v19, %v3096_v18  ;;  %v2952_v29 = vld [vmem:[%s5629_s1 + $0x460] sm:$0xf]  ;;  %v3704_v32 = vld [vmem:[%s5629_s1 + $0x56c] sm:$0xf0]  ;;  %v2538_v3 = vld [vmem:[%s5629_s1 + $0x130] sm:$0xf0] }
  0x2c   :  { %v3080_v31 = vld [vmem:[%s5629_s1 + $0x560] sm:$0xf]  ;;  %v2953_v37 = vor.u32 %v3672_v30, %v2952_v29  ;;  %v3668_v43 = vld [vmem:[%s5629_s1 + $0x44c] sm:$0xf0]  ;;  %v3530_v12 = vld [vmem:[%s5629_s1 + $0x4] sm:$0xf]  ;;  %v2541_v19 = vor.u32 %v3566_v0, %v2538_v3 }
  0x2d   :  { %1306 = vmatpush.bf16.msrb.mxu0 %v2985_v11  ;;  %1319 = vmatpush.bf16.msrb.mxu1 %v3113_v14  ;;  %v3081_v40 = vor.u32 %v3704_v32, %v3080_v31  ;;  %v2936_v42 = vld [vmem:[%s5629_s1 + $0x440] sm:$0xf]  ;;  %v3700_v45 = vld [vmem:[%s5629_s1 + $0x54c] sm:$0xf0]  ;;  %v2394_v13 = vld [vmem:[%s5629_s1 + $0x10] sm:$0xf0] }
  0x2e   :  { %v3064_v44 = vld [vmem:[%s5629_s1 + $0x540] sm:$0xf]  ;;  %v2937_v50 = vor.u32 %v3668_v43, %v2936_v42  ;;  %v3664_v58 = vld [vmem:[%s5629_s1 + $0x42c] sm:$0xf0]  ;;  %v3622_v14 = vld [vmem:[%s5629_s1 + $0x2e4] sm:$0xf]  ;;  %v2397_v25 = vor.u32 %v3530_v12, %v2394_v13 }
  0x2f   :  { %1357 = vmatpush.bf16.msra.mxu2 %v2621_v10  ;;  %1345 = vmatpush.bf16.msrb.mxu3 %v2477_v15  ;;  %v3065_v54 = vor.u32 %v3700_v45, %v3064_v44  ;;  %v2920_v56 = vld [vmem:[%s5629_s1 + $0x420] sm:$0xf]  ;;  %v3696_v61 = vld [vmem:[%s5629_s1 + $0x52c] sm:$0xf0]  ;;  %v2762_v15 = vld [vmem:[%s5629_s1 + $0x2f0] sm:$0xf0] }
  0x30   :  { %v3048_v59 = vld [vmem:[%s5629_s1 + $0x520] sm:$0xf]  ;;  %v2921_v2 = vor.u32 %v3664_v58, %v2920_v56  ;;  %v36_v5 = vld [vmem:[%s5628_s0 + $0x10] sm:$0xff]  ;;  %v3654_v16 = vld [vmem:[%s5629_s1 + $0x3e4] sm:$0xf] }
  0x31   :  { %1307 = vmatpush.bf16.msrb.mxu0 %v2969_v24  ;;  %1320 = vmatpush.bf16.msrb.mxu1 %v3097_v27  ;;  %v2904_v4 = vld [vmem:[%s5629_s1 + $0x400] sm:$0xf]  ;;  %v3049_v6 = vor.u32 %v3696_v61, %v3048_v59  ;;  %v3660_v8 = vld [vmem:[%s5629_s1 + $0x40c] sm:$0xf0]  ;;  %v2890_v17 = vld [vmem:[%s5629_s1 + $0x3f0] sm:$0xf0]  ;;  %v252_v18 = vunpack.c.l.b16 %v36_v5 }
  0x32   :  { %v3032_v10 = vld [vmem:[%s5629_s1 + $0x500] sm:$0xf]  ;;  %v3692_v11 = vld [vmem:[%s5629_s1 + $0x50c] sm:$0xf0]  ;;  %v2905_v20 = vor.u32 %v3660_v8, %v2904_v4  ;;  %v3686_v21 = vld [vmem:[%s5629_s1 + $0x4e4] sm:$0xf]  ;;  %v2893_v29 = vor.u32 %v3654_v16, %v2890_v17 }
  0x33   :  { %1358 = vmatpush.bf16.msra.mxu2 %v2605_v23  ;;  %1346 = vmatpush.bf16.msrb.mxu3 %v2461_v28  ;;  %v3018_v22 = vld [vmem:[%s5629_s1 + $0x4f0] sm:$0xf0]  ;;  %v253_v23 = vunpack.c.h.b16 %v36_v5  ;;  %v3033_v24 = vor.u32 %v3692_v11, %v3032_v10  ;;  %v3562_v26 = vld [vmem:[%s5629_s1 + $0x104] sm:$0xf]  ;;  %v2765_v28 = vor.u32 %v3622_v14, %v2762_v15  ;;  %v4343_v34 = vpack.c.b16 %v252_v18, %v252_v18 }
  0x34   :  { %v2522_v27 = vld [vmem:[%s5629_s1 + $0x110] sm:$0xf0]  ;;  %v3718_v30 = vld [vmem:[%s5629_s1 + $0x5e4] sm:$0xf]  ;;  %v3021_v33 = vor.u32 %v3686_v21, %v3018_v22 }
  0x35   :  { %1308 = vmatpush.bf16.msrb.mxu0 %v2953_v37  ;;  %1321 = vmatpush.bf16.msrb.mxu1 %v3081_v40  ;;  %v3146_v31 = vld [vmem:[%s5629_s1 + $0x5f0] sm:$0xf0]  ;;  %v3618_v32 = vld [vmem:[%s5629_s1 + $0x2c4] sm:$0xf]  ;;  %v2525_v38 = vor.u32 %v3562_v26, %v2522_v27  ;;  %v4354_v39 = vpack.c.b16 %v253_v23, %v253_v23 }
  0x36   :  { %3174 = vmatmul.msk.bf16.vlgmr.msrb.gmra.mxu2 %vm1248_vm0, %v4255_v48  ;;  %v2746_v35 = vld [vmem:[%s5629_s1 + $0x2d0] sm:$0xf0]  ;;  %v3682_v40 = vld [vmem:[%s5629_s1 + $0x4c4] sm:$0xf]  ;;  %v3149_v42 = vor.u32 %v3718_v30, %v3146_v31 }
  0x37   :  { %1359 = vmatpush.bf16.msra.mxu2 %v2589_v36  ;;  %1347 = vmatpush.bf16.msrb.mxu3 %v2445_v41  ;;  %v3650_v36 = vld [vmem:[%s5629_s1 + $0x3c4] sm:$0xf]  ;;  %v2874_v37 = vld [vmem:[%s5629_s1 + $0x3d0] sm:$0xf0]  ;;  %v2749_v43 = vor.u32 %v3618_v32, %v2746_v35 }
  0x38   :  { %v3002_v41 = vld [vmem:[%s5629_s1 + $0x4d0] sm:$0xf0]  ;;  %v2877_v44 = vor.u32 %v3650_v36, %v2874_v37  ;;  %v3714_v45 = vld [vmem:[%s5629_s1 + $0x5c4] sm:$0xf] }
  0x39   :  { %1309 = vmatpush.bf16.msrb.mxu0 %v2937_v50  ;;  %1322 = vmatpush.bf16.msrb.mxu1 %v3065_v54  ;;  %v3130_v46 = vld [vmem:[%s5629_s1 + $0x5d0] sm:$0xf0]  ;;  %v3614_v47 = vld [vmem:[%s5629_s1 + $0x2a4] sm:$0xf] }
  0x3a   :  { %v2730_v50 = vld [vmem:[%s5629_s1 + $0x2b0] sm:$0xf0]  ;;  %v3646_v51 = vld [vmem:[%s5629_s1 + $0x3a4] sm:$0xf]  ;;  %v3133_v56 = vor.u32 %v3714_v45, %v3130_v46 }
  0x3b   :  { %1360 = vmatpush.bf16.msra.mxu2 %v2573_v49  ;;  %1348 = vmatpush.bf16.msrb.mxu3 %v2429_v55  ;;  %v3005_v49 = vor.u32 %v3682_v40, %v3002_v41  ;;  %v2858_v52 = vld [vmem:[%s5629_s1 + $0x3b0] sm:$0xf0]  ;;  %v3678_v54 = vld [vmem:[%s5629_s1 + $0x4a4] sm:$0xf]  ;;  %v2733_v58 = vor.u32 %v3614_v47, %v2730_v50 }
  0x3c   :  { %v2986_v55 = vld [vmem:[%s5629_s1 + $0x4b0] sm:$0xf0]  ;;  %v2861_v59 = vor.u32 %v3646_v51, %v2858_v52  ;;  %v3710_v61 = vld [vmem:[%s5629_s1 + $0x5a4] sm:$0xf] }
  0x3d   :  { %1310 = vmatpush.bf16.msrb.mxu0 %v2921_v2  ;;  %1323 = vmatpush.bf16.msrb.mxu1 %v3049_v6  ;;  %v3114_v62 = vld [vmem:[%s5629_s1 + $0x5b0] sm:$0xf0]  ;;  %v3610_v63 = vld [vmem:[%s5629_s1 + $0x284] sm:$0xf]  ;;  %v2989_v0 = vor.u32 %v3678_v54, %v2986_v55 }
  0x3e   :  { %v3642_v2 = vld [vmem:[%s5629_s1 + $0x384] sm:$0xf]  ;;  %v2842_v3 = vld [vmem:[%s5629_s1 + $0x390] sm:$0xf0]  ;;  %v3117_v6 = vor.u32 %v3710_v61, %v3114_v62 }
  0x3f   :  { %1361 = vmatpush.bf16.msra.mxu2 %v2557_v1  ;;  %1349 = vmatpush.bf16.msrb.mxu3 %v2413_v7  ;;  %v2714_v1 = vld [vmem:[%s5629_s1 + $0x290] sm:$0xf0]  ;;  %v3674_v4 = vld [vmem:[%s5629_s1 + $0x484] sm:$0xf]  ;;  %v2845_v8 = vor.u32 %v3642_v2, %v2842_v3 }
  0x40   :  { %v2970_v5 = vld [vmem:[%s5629_s1 + $0x490] sm:$0xf0]  ;;  %v2717_v7 = vor.u32 %v3610_v63, %v2714_v1  ;;  %v3706_v10 = vld [vmem:[%s5629_s1 + $0x584] sm:$0xf] }
  0x41   :  { %1311 = vmatpush.bf16.msrb.mxu0 %v2905_v20  ;;  %1324 = vmatpush.bf16.msrb.mxu1 %v3033_v24  ;;  %v3098_v11 = vld [vmem:[%s5629_s1 + $0x590] sm:$0xf0]  ;;  %v3606_v12 = vld [vmem:[%s5629_s1 + $0x264] sm:$0xf]  ;;  %v2973_v13 = vor.u32 %v3674_v4, %v2970_v5 }
  0x42   :  { %v2698_v14 = vld [vmem:[%s5629_s1 + $0x270] sm:$0xf0]  ;;  %v3638_v15 = vld [vmem:[%s5629_s1 + $0x364] sm:$0xf] }
  0x43   :  { %1362 = vmatpush.bf16.msra.mxu2 %v2541_v19  ;;  %1350 = vmatpush.bf16.msrb.mxu3 %v2397_v25  ;;  %v2826_v16 = vld [vmem:[%s5629_s1 + $0x370] sm:$0xf0]  ;;  %v3670_v17 = vld [vmem:[%s5629_s1 + $0x464] sm:$0xf]  ;;  %v3101_v19 = vor.u32 %v3706_v10, %v3098_v11  ;;  %v2701_v20 = vor.u32 %v3606_v12, %v2698_v14 }
  0x44   :  { %1312 = vmatmul.bf16.vlgmr.msrb.gmra.mxu0 %v4343_v34  ;;  %1325 = vmatmul.bf16.vlgmr.msrb.gmra.mxu1 %v4354_v39  ;;  %v2954_v18 = vld [vmem:[%s5629_s1 + $0x470] sm:$0xf0]  ;;  %v2829_v21 = vor.u32 %v3638_v15, %v2826_v16  ;;  %v3702_v22 = vld [vmem:[%s5629_s1 + $0x564] sm:$0xf] }
  0x45   :  { %1369 = vmatpush.bf16.msra.mxu0 %v2765_v28  ;;  %1382 = vmatpush.bf16.msra.mxu1 %v2893_v29  ;;  %v3082_v23 = vld [vmem:[%s5629_s1 + $0x570] sm:$0xf0]  ;;  %v3602_v24 = vld [vmem:[%s5629_s1 + $0x244] sm:$0xf]  ;;  %v2957_v25 = vor.u32 %v3670_v17, %v2954_v18 }
  0x46   :  { %1351 = vmatmul.bf16.vlgmr.msrb.gmra.mxu3 %v4146_v57  ;;  %v2682_v26 = vld [vmem:[%s5629_s1 + $0x250] sm:$0xf0]  ;;  %v3634_v27 = vld [vmem:[%s5629_s1 + $0x344] sm:$0xf]  ;;  %v3085_v31 = vor.u32 %v3702_v22, %v3082_v23 }
  0x47   :  { %1395 = vmatpush.bf16.msra.mxu3 %v3021_v33  ;;  %1363 = vmatpush.bf16.msra.mxu2 %v2525_v38  ;;  %v2810_v28 = vld [vmem:[%s5629_s1 + $0x350] sm:$0xf0]  ;;  %v3666_v29 = vld [vmem:[%s5629_s1 + $0x444] sm:$0xf]  ;;  %v2685_v33 = vor.u32 %v3602_v24, %v2682_v26 }
  0x48   :  { %v2938_v30 = vld [vmem:[%s5629_s1 + $0x450] sm:$0xf0]  ;;  %v3698_v32 = vld [vmem:[%s5629_s1 + $0x544] sm:$0xf]  ;;  %v2813_v35 = vor.u32 %v3634_v27, %v2810_v28 }
  0x49   :  { %1370 = vmatpush.bf16.msra.mxu0 %v2749_v43  ;;  %1383 = vmatpush.bf16.msra.mxu1 %v2877_v44  ;;  %v3066_v36 = vld [vmem:[%s5629_s1 + $0x550] sm:$0xf0]  ;;  %v3598_v37 = vld [vmem:[%s5629_s1 + $0x224] sm:$0xf]  ;;  %v2941_v40 = vor.u32 %v3666_v29, %v2938_v30 }
  0x4a   :  { %1364 = vmatmul.bf16.vlgmr.msra.gmra.mxu2 %v4176_v9  ;;  %v2666_v38 = vld [vmem:[%s5629_s1 + $0x230] sm:$0xf0]  ;;  %v3630_v41 = vld [vmem:[%s5629_s1 + $0x324] sm:$0xf]  ;;  %v3069_v47 = vor.u32 %v3698_v32, %v3066_v36 }
  0x4b   :  { %1408 = vmatpush.bf16.msrb.mxu2 %v3149_v42  ;;  %1396 = vmatpush.bf16.msra.mxu3 %v3005_v49  ;;  %v2794_v42 = vld [vmem:[%s5629_s1 + $0x330] sm:$0xf0]  ;;  %v3662_v43 = vld [vmem:[%s5629_s1 + $0x424] sm:$0xf]  ;;  %v2669_v52 = vor.u32 %v3598_v37, %v2666_v38 }
  0x4c   :  { %v2922_v44 = vld [vmem:[%s5629_s1 + $0x430] sm:$0xf0]  ;;  %v3694_v45 = vld [vmem:[%s5629_s1 + $0x524] sm:$0xf]  ;;  %v2797_v54 = vor.u32 %v3630_v41, %v2794_v42 }
  0x4d   :  { %1371 = vmatpush.bf16.msra.mxu0 %v2733_v58  ;;  %1384 = vmatpush.bf16.msra.mxu1 %v2861_v59  ;;  %v3050_v46 = vld [vmem:[%s5629_s1 + $0x530] sm:$0xf0]  ;;  %v3594_v49 = vld [vmem:[%s5629_s1 + $0x204] sm:$0xf]  ;;  %v2925_v59 = vor.u32 %v3662_v43, %v2922_v44 }
  0x4e   :  { %v2650_v50 = vld [vmem:[%s5629_s1 + $0x210] sm:$0xf0]  ;;  %v3626_v51 = vld [vmem:[%s5629_s1 + $0x304] sm:$0xf] }
  0x4f   :  { %1409 = vmatpush.bf16.msrb.mxu2 %v3133_v56  ;;  %1397 = vmatpush.bf16.msra.mxu3 %v2989_v0  ;;  %v2778_v55 = vld [vmem:[%s5629_s1 + $0x310] sm:$0xf0]  ;;  %v3658_v56 = vld [vmem:[%s5629_s1 + $0x404] sm:$0xf] }
  0x50   :  { %v2906_v58 = vld [vmem:[%s5629_s1 + $0x410] sm:$0xf0] }
  0x51   :  { %1372 = vmatpush.bf16.msra.mxu0 %v2717_v7  ;;  %1385 = vmatpush.bf16.msra.mxu1 %v2845_v8 }
  0x53   :  { %1410 = vmatpush.bf16.msrb.mxu2 %v3117_v6  ;;  %1398 = vmatpush.bf16.msra.mxu3 %v2973_v13 }
  0x55   :  { %1373 = vmatpush.bf16.msra.mxu0 %v2701_v20  ;;  %1386 = vmatpush.bf16.msra.mxu1 %v2829_v21 }
  0x57   :  { %1411 = vmatpush.bf16.msrb.mxu2 %v3101_v19  ;;  %1399 = vmatpush.bf16.msra.mxu3 %v2957_v25 }
  0x59   :  { %1374 = vmatpush.bf16.msra.mxu0 %v2685_v33  ;;  %1387 = vmatpush.bf16.msra.mxu1 %v2813_v35 }
  0x5b   :  { %1412 = vmatpush.bf16.msrb.mxu2 %v3085_v31  ;;  %1400 = vmatpush.bf16.msra.mxu3 %v2941_v40 }
  0x5c   :  { %14 = vsyncpa [#allocation3], 0  ;;  %v2512_v61 = vld [vmem:[%s5629_s1 + $0xe8] sm:$0xf]  ;;  %v3561_v62 = vld [vmem:[%s5629_s1 + $0xf4] sm:$0xf0]  ;;  %v3053_v0 = vor.u32 %v3694_v45, %v3050_v46  ;;  %v2653_v4 = vor.u32 %v3594_v49, %v2650_v50  ;;  %v2781_v5 = vor.u32 %v3626_v51, %v2778_v55  ;;  %v2909_v10 = vor.u32 %v3658_v56, %v2906_v58 }
  0x5d   :  { %v2640_v63 = vld [vmem:[%s5629_s1 + $0x1e8] sm:$0xf]  ;;  %v3593_v1 = vld [vmem:[%s5629_s1 + $0x1f4] sm:$0xf0]  ;;  %v3722_v2 = vld [vmem:[%s5629_s1 + $0x604] sm:$0xf]  ;;  %1375 = vmatpush.bf16.msra.mxu0 %v2669_v52  ;;  %1388 = vmatpush.bf16.msra.mxu1 %v2797_v54  ;;  %v2513_v11 = vor.u32 %v3561_v62, %v2512_v61 }
  0x5e   :  { %v3162_v3 = vld [vmem:[%s5629_s1 + $0x610] sm:$0xf0]  ;;  %v3690_v6 = vld [vmem:[%s5629_s1 + $0x504] sm:$0xf]  ;;  %v2768_v8 = vld [vmem:[%s5629_s1 + $0x2e8] sm:$0xf]  ;;  %v2641_v15 = vor.u32 %v3593_v1, %v2640_v63 }
  0x5f   :  { %1413 = vmatpush.bf16.msrb.mxu2 %v3069_v47  ;;  %v3034_v7 = vld [vmem:[%s5629_s1 + $0x510] sm:$0xf0]  ;;  %1401 = vmatpush.bf16.msra.mxu3 %v2925_v59  ;;  %v3625_v12 = vld [vmem:[%s5629_s1 + $0x2f4] sm:$0xf0]  ;;  %v2896_v13 = vld [vmem:[%s5629_s1 + $0x3e8] sm:$0xf]  ;;  %v3165_v16 = vor.u32 %v3722_v2, %v3162_v3 }
  0x60   :  { %v3657_v14 = vld [vmem:[%s5629_s1 + $0x3f4] sm:$0xf0]  ;;  %v2496_v17 = vld [vmem:[%s5629_s1 + $0xc8] sm:$0xf]  ;;  %v3037_v19 = vor.u32 %v3690_v6, %v3034_v7  ;;  %v2769_v22 = vor.u32 %v3625_v12, %v2768_v8  ;;  %s2381_s16 = sshll.u32 %s5637_s9, 4  ;;  %s2382_s16 = int_to_ptr.hbm [resolvable:$true] %s2381_s16 }
  0x61   :  { %v3557_v18 = vld [vmem:[%s5629_s1 + $0xd4] sm:$0xf0]  ;;  %v2624_v20 = vld [vmem:[%s5629_s1 + $0x1c8] sm:$0xf]  ;;  %1376 = vmatpush.bf16.msra.mxu0 %v2653_v4  ;;  %1389 = vmatpush.bf16.msra.mxu1 %v2781_v5  ;;  %v2897_v23 = vor.u32 %v3657_v14, %v2896_v13 }
  0x62   :  { %v3589_v21 = vld [vmem:[%s5629_s1 + $0x1d4] sm:$0xf0]  ;;  %v2752_v24 = vld [vmem:[%s5629_s1 + $0x2c8] sm:$0xf]  ;;  %v2497_v25 = vor.u32 %v3557_v18, %v2496_v17 }
  0x63   :  { %1414 = vmatpush.bf16.msrb.mxu2 %v3053_v0  ;;  %1402 = vmatpush.bf16.msra.mxu3 %v2909_v10  ;;  %v3621_v26 = vld [vmem:[%s5629_s1 + $0x2d4] sm:$0xf0]  ;;  %v2880_v27 = vld [vmem:[%s5629_s1 + $0x3c8] sm:$0xf]  ;;  %v2625_v29 = vor.u32 %v3589_v21, %v2624_v20 }
  0x64   :  { %v3653_v28 = vld [vmem:[%s5629_s1 + $0x3d4] sm:$0xf0]  ;;  %v2480_v30 = vld [vmem:[%s5629_s1 + $0xa8] sm:$0xf]  ;;  %1377 = vmatmul.bf16.vlgmr.msra.gmra.mxu0 %v4135_v53  ;;  %v2753_v35 = vor.u32 %v3621_v26, %v2752_v24  ;;  %1390 = vmatmul.bf16.vlgmr.msra.gmra.mxu1 %v4148_v60 }
  0x65   :  { %1434 = vmatpush.bf16.msrb.mxu1 %v2513_v11  ;;  %1428 = vmatpush.bf16.msrb.mxu0 %v3165_v16  ;;  %v3553_v31 = vld [vmem:[%s5629_s1 + $0xb4] sm:$0xf0]  ;;  %v2608_v32 = vld [vmem:[%s5629_s1 + $0x1a8] sm:$0xf]  ;;  %v2881_v36 = vor.u32 %v3653_v28, %v2880_v27 }
  0x66   :  { %v3585_v33 = vld [vmem:[%s5629_s1 + $0x1b4] sm:$0xf0]  ;;  %v2736_v37 = vld [vmem:[%s5629_s1 + $0x2a8] sm:$0xf]  ;;  %1403 = vmatmul.bf16.vlgmr.msra.gmra.mxu3 %v4343_v34  ;;  %v2481_v38 = vor.u32 %v3553_v31, %v2480_v30 }
  0x67   :  { %1447 = vmatpush.bf16.msrb.mxu3 %v2641_v15  ;;  %1415 = vmatpush.bf16.msrb.mxu2 %v3037_v19  ;;  %v3617_v40 = vld [vmem:[%s5629_s1 + $0x2b4] sm:$0xf0]  ;;  %v2864_v41 = vld [vmem:[%s5629_s1 + $0x3a8] sm:$0xf]  ;;  %v2609_v43 = vor.u32 %v3585_v33, %v2608_v32 }
  0x68   :  { %v3649_v42 = vld [vmem:[%s5629_s1 + $0x3b4] sm:$0xf0]  ;;  %v2464_v44 = vld [vmem:[%s5629_s1 + $0x88] sm:$0xf]  ;;  %v2737_v49 = vor.u32 %v3617_v40, %v2736_v37 }
  0x69   :  { %1460 = vmatpush.bf16.msra.mxu0 %v2769_v22  ;;  %1435 = vmatpush.bf16.msrb.mxu1 %v2497_v25  ;;  %v3549_v45 = vld [vmem:[%s5629_s1 + $0x94] sm:$0xf0]  ;;  %v2592_v46 = vld [vmem:[%s5629_s1 + $0x188] sm:$0xf]  ;;  %v2865_v50 = vor.u32 %v3649_v42, %v2864_v41 }
  0x6a   :  { %1416 = vmatmul.bf16.vlgmr.msrb.gmra.mxu2 %v4354_v39  ;;  %v3581_v47 = vld [vmem:[%s5629_s1 + $0x194] sm:$0xf0]  ;;  %v2720_v51 = vld [vmem:[%s5629_s1 + $0x288] sm:$0xf]  ;;  %v2465_v52 = vor.u32 %v3549_v45, %v2464_v44 }
  0x6b   :  { %1473 = vmatpush.bf16.msra.mxu2 %v2897_v23  ;;  %1448 = vmatpush.bf16.msrb.mxu3 %v2625_v29  ;;  %v3613_v54 = vld [vmem:[%s5629_s1 + $0x294] sm:$0xf0]  ;;  %v2848_v55 = vld [vmem:[%s5629_s1 + $0x388] sm:$0xf]  ;;  %v2593_v58 = vor.u32 %v3581_v47, %v2592_v46 }
  0x6c   :  { %v3645_v56 = vld [vmem:[%s5629_s1 + $0x394] sm:$0xf0]  ;;  %v2448_v59 = vld [vmem:[%s5629_s1 + $0x68] sm:$0xf]  ;;  %v2721_v0 = vor.u32 %v3613_v54, %v2720_v51  ;;  %v3559_v51 = vld [vmem:[%s5629_s1 + $0xec] sm:$0xf] }
  0x6d   :  { %1461 = vmatpush.bf16.msra.mxu0 %v2753_v35  ;;  %1436 = vmatpush.bf16.msrb.mxu1 %v2481_v38  ;;  %v3545_v61 = vld [vmem:[%s5629_s1 + $0x74] sm:$0xf0]  ;;  %v2576_v62 = vld [vmem:[%s5629_s1 + $0x168] sm:$0xf]  ;;  %v2849_v1 = vor.u32 %v3645_v56, %v2848_v55  ;;  %v2514_v55 = vld [vmem:[%s5629_s1 + $0xf8] sm:$0xf0] }
  0x6e   :  { %v3577_v63 = vld [vmem:[%s5629_s1 + $0x174] sm:$0xf0]  ;;  %v2704_v2 = vld [vmem:[%s5629_s1 + $0x268] sm:$0xf]  ;;  %v2449_v3 = vor.u32 %v3545_v61, %v2448_v59 }
  0x6f   :  { %1474 = vmatpush.bf16.msra.mxu2 %v2881_v36  ;;  %1449 = vmatpush.bf16.msrb.mxu3 %v2609_v43  ;;  %v3609_v4 = vld [vmem:[%s5629_s1 + $0x274] sm:$0xf0]  ;;  %v2832_v5 = vld [vmem:[%s5629_s1 + $0x368] sm:$0xf]  ;;  %v2577_v7 = vor.u32 %v3577_v63, %v2576_v62 }
  0x70   :  { %v3641_v6 = vld [vmem:[%s5629_s1 + $0x374] sm:$0xf0]  ;;  %v2432_v8 = vld [vmem:[%s5629_s1 + $0x48] sm:$0xf]  ;;  %v2705_v13 = vor.u32 %v3609_v4, %v2704_v2 }
  0x71   :  { %1462 = vmatpush.bf16.msra.mxu0 %v2737_v49  ;;  %1437 = vmatpush.bf16.msrb.mxu1 %v2465_v52  ;;  %v3541_v10 = vld [vmem:[%s5629_s1 + $0x54] sm:$0xf0]  ;;  %v2560_v11 = vld [vmem:[%s5629_s1 + $0x148] sm:$0xf]  ;;  %v2833_v14 = vor.u32 %v3641_v6, %v2832_v5  ;;  %v3591_v5 = vld [vmem:[%s5629_s1 + $0x1ec] sm:$0xf] }
  0x72   :  { %v3573_v12 = vld [vmem:[%s5629_s1 + $0x154] sm:$0xf0]  ;;  %v2688_v15 = vld [vmem:[%s5629_s1 + $0x248] sm:$0xf]  ;;  %v2433_v16 = vor.u32 %v3541_v10, %v2432_v8  ;;  %v2642_v6 = vld [vmem:[%s5629_s1 + $0x1f8] sm:$0xf0] }
  0x73   :  { %1475 = vmatpush.bf16.msra.mxu2 %v2865_v50  ;;  %1450 = vmatpush.bf16.msrb.mxu3 %v2593_v58  ;;  %v3605_v17 = vld [vmem:[%s5629_s1 + $0x254] sm:$0xf0]  ;;  %v2816_v18 = vld [vmem:[%s5629_s1 + $0x348] sm:$0xf]  ;;  %v2561_v20 = vor.u32 %v3573_v12, %v2560_v11  ;;  %v3555_v8 = vld [vmem:[%s5629_s1 + $0xcc] sm:$0xf] }
  0x74   :  { %v3637_v19 = vld [vmem:[%s5629_s1 + $0x354] sm:$0xf0]  ;;  %v2416_v21 = vld [vmem:[%s5629_s1 + $0x28] sm:$0xf]  ;;  %3175 = vmatmul.msk.bf16.vlgmr.msrb.gmra.mxu0 %vm1248_vm0, %v4255_v48  ;;  %v2689_v25 = vor.u32 %v3605_v17, %v2688_v15  ;;  %v2498_v10 = vld [vmem:[%s5629_s1 + $0xd8] sm:$0xf0] }
  0x75   :  { %1463 = vmatpush.bf16.msra.mxu0 %v2721_v0  ;;  %1438 = vmatpush.bf16.msrb.mxu1 %v2449_v3  ;;  %v3537_v22 = vld [vmem:[%s5629_s1 + $0x34] sm:$0xf0]  ;;  %v2544_v23 = vld [vmem:[%s5629_s1 + $0x128] sm:$0xf]  ;;  %v2817_v26 = vor.u32 %v3637_v19, %v2816_v18  ;;  %v2517_v3 = vor.u32 %v3559_v51, %v2514_v55  ;;  %v2501_v17 = vor.u32 %v3555_v8, %v2498_v10  ;;  %v3587_v18 = vld [vmem:[%s5629_s1 + $0x1cc] sm:$0xf] }
  0x76   :  { %v3569_v24 = vld [vmem:[%s5629_s1 + $0x134] sm:$0xf0]  ;;  %v2672_v27 = vld [vmem:[%s5629_s1 + $0x228] sm:$0xf]  ;;  %v2417_v29 = vor.u32 %v3537_v22, %v2416_v21  ;;  %v2626_v19 = vld [vmem:[%s5629_s1 + $0x1d8] sm:$0xf0] }
  0x77   :  { %1476 = vmatpush.bf16.msra.mxu2 %v2849_v1  ;;  %1451 = vmatpush.bf16.msrb.mxu3 %v2577_v7  ;;  %v3601_v28 = vld [vmem:[%s5629_s1 + $0x234] sm:$0xf0]  ;;  %v2800_v30 = vld [vmem:[%s5629_s1 + $0x328] sm:$0xf]  ;;  %v2545_v33 = vor.u32 %v3569_v24, %v2544_v23  ;;  %v3551_v21 = vld [vmem:[%s5629_s1 + $0xac] sm:$0xf] }
  0x78   :  { %v3633_v31 = vld [vmem:[%s5629_s1 + $0x334] sm:$0xf0]  ;;  %v2400_v32 = vld [vmem:[%s5629_s1 + $0x8] sm:$0xf]  ;;  %v2673_v42 = vor.u32 %v3601_v28, %v2672_v27  ;;  %v2482_v22 = vld [vmem:[%s5629_s1 + $0xb8] sm:$0xf0] }
  0x79   :  { %1464 = vmatpush.bf16.msra.mxu0 %v2705_v13  ;;  %1439 = vmatpush.bf16.msrb.mxu1 %v2433_v16  ;;  %v3533_v35 = vld [vmem:[%s5629_s1 + $0x14] sm:$0xf0]  ;;  %v2528_v36 = vld [vmem:[%s5629_s1 + $0x108] sm:$0xf]  ;;  %v2801_v43 = vor.u32 %v3633_v31, %v2800_v30  ;;  %v3583_v30 = vld [vmem:[%s5629_s1 + $0x1ac] sm:$0xf] }
  0x7a   :  { %v3565_v37 = vld [vmem:[%s5629_s1 + $0x114] sm:$0xf0]  ;;  %v3024_v38 = vld [vmem:[%s5629_s1 + $0x4e8] sm:$0xf]  ;;  %v2401_v47 = vor.u32 %v3533_v35, %v2400_v32  ;;  %v2610_v31 = vld [vmem:[%s5629_s1 + $0x1b8] sm:$0xf0] }
  0x7b   :  { %1477 = vmatpush.bf16.msra.mxu2 %v2833_v14  ;;  %1452 = vmatpush.bf16.msrb.mxu3 %v2561_v20  ;;  %v3689_v40 = vld [vmem:[%s5629_s1 + $0x4f4] sm:$0xf0]  ;;  %v3152_v41 = vld [vmem:[%s5629_s1 + $0x5e8] sm:$0xf]  ;;  %v2529_v52 = vor.u32 %v3565_v37, %v2528_v36  ;;  %v2645_v14 = vor.u32 %v3591_v5, %v2642_v6  ;;  %v2466_v35 = vld [vmem:[%s5629_s1 + $0x98] sm:$0xf0] }
  0x7c   :  { %v3721_v44 = vld [vmem:[%s5629_s1 + $0x5f4] sm:$0xf0]  ;;  %v2656_v45 = vld [vmem:[%s5629_s1 + $0x208] sm:$0xf]  ;;  %v3025_v54 = vor.u32 %v3689_v40, %v3024_v38  ;;  %v2613_v40 = vor.u32 %v3583_v30, %v2610_v31  ;;  %v3571_v8 = vld [vmem:[%s5629_s1 + $0x14c] sm:$0xf] }
  0x7d   :  { %1465 = vmatpush.bf16.msra.mxu0 %v2689_v25  ;;  %v3597_v46 = vld [vmem:[%s5629_s1 + $0x214] sm:$0xf0]  ;;  %1440 = vmatpush.bf16.msrb.mxu1 %v2417_v29  ;;  %v2784_v49 = vld [vmem:[%s5629_s1 + $0x308] sm:$0xf]  ;;  %v3153_v59 = vor.u32 %v3721_v44, %v3152_v41  ;;  %v2485_v29 = vor.u32 %v3551_v21, %v2482_v22  ;;  %v3579_v44 = vld [vmem:[%s5629_s1 + $0x18c] sm:$0xf] }
  0x7e   :  { %v3629_v50 = vld [vmem:[%s5629_s1 + $0x314] sm:$0xf0]  ;;  %v3168_v56 = vld [vmem:[%s5629_s1 + $0x608] sm:$0xf]  ;;  %v2657_v63 = vor.u32 %v3597_v46, %v2656_v45  ;;  %v2594_v45 = vld [vmem:[%s5629_s1 + $0x198] sm:$0xf0] }
  0x7f   :  { %1478 = vmatpush.bf16.msra.mxu2 %v2817_v26  ;;  %1453 = vmatpush.bf16.msrb.mxu3 %v2545_v33  ;;  %v3725_v58 = vld [vmem:[%s5629_s1 + $0x614] sm:$0xf0]  ;;  %v3008_v61 = vld [vmem:[%s5629_s1 + $0x4c8] sm:$0xf]  ;;  %v2785_v0 = vor.u32 %v3629_v50, %v2784_v49  ;;  %v2629_v26 = vor.u32 %v3587_v18, %v2626_v19  ;;  %v3547_v33 = vld [vmem:[%s5629_s1 + $0x8c] sm:$0xf] }
  0x80   :  { %v3685_v62 = vld [vmem:[%s5629_s1 + $0x4d4] sm:$0xf0]  ;;  %v3136_v1 = vld [vmem:[%s5629_s1 + $0x5c8] sm:$0xf]  ;;  %v3169_v4 = vor.u32 %v3725_v58, %v3168_v56  ;;  %v2450_v49 = vld [vmem:[%s5629_s1 + $0x78] sm:$0xf0] }
  0x81   :  { %1466 = vmatpush.bf16.msra.mxu0 %v2673_v42  ;;  %v3717_v2 = vld [vmem:[%s5629_s1 + $0x5d4] sm:$0xf0]  ;;  %1441 = vmatpush.bf16.msrb.mxu1 %v2401_v47  ;;  %v3009_v7 = vor.u32 %v3685_v62, %v3008_v61  ;;  %v2992_v12 = vld [vmem:[%s5629_s1 + $0x4a8] sm:$0xf]  ;;  %v3543_v47 = vld [vmem:[%s5629_s1 + $0x6c] sm:$0xf] }
  0x82   :  { %v3137_v11 = vor.u32 %v3717_v2, %v3136_v1  ;;  %v3681_v13 = vld [vmem:[%s5629_s1 + $0x4b4] sm:$0xf0]  ;;  %v3120_v15 = vld [vmem:[%s5629_s1 + $0x5a8] sm:$0xf]  ;;  %v2453_v58 = vor.u32 %v3543_v47, %v2450_v49  ;;  %v2578_v61 = vld [vmem:[%s5629_s1 + $0x178] sm:$0xf0] }
  0x83   :  { %1479 = vmatpush.bf16.msra.mxu2 %v2801_v43  ;;  %1454 = vmatpush.bf16.msrb.mxu3 %v2529_v52  ;;  %v3713_v16 = vld [vmem:[%s5629_s1 + $0x5b4] sm:$0xf0]  ;;  %v2993_v20 = vor.u32 %v3681_v13, %v2992_v12  ;;  %v2976_v24 = vld [vmem:[%s5629_s1 + $0x488] sm:$0xf]  ;;  %v2469_v43 = vor.u32 %v3547_v33, %v2466_v35  ;;  %v2562_v10 = vld [vmem:[%s5629_s1 + $0x158] sm:$0xf0] }
  0x84   :  { %v3121_v23 = vor.u32 %v3713_v16, %v3120_v15  ;;  %v3677_v25 = vld [vmem:[%s5629_s1 + $0x494] sm:$0xf0]  ;;  %1442 = vmatmul.bf16.vlgmr.msrb.gmra.mxu1 %v4146_v57  ;;  %v3104_v27 = vld [vmem:[%s5629_s1 + $0x588] sm:$0xf]  ;;  %v3535_v12 = vld [vmem:[%s5629_s1 + $0x2c] sm:$0xf]  ;;  %v2565_v19 = vor.u32 %v3571_v8, %v2562_v10 }
  0x85   :  { %1486 = vmatpush.bf16.msra.mxu1 %v3025_v54  ;;  %1467 = vmatpush.bf16.msra.mxu0 %v2657_v63  ;;  %v3709_v28 = vld [vmem:[%s5629_s1 + $0x594] sm:$0xf0]  ;;  %v2977_v32 = vor.u32 %v3677_v25, %v2976_v24  ;;  %v2960_v37 = vld [vmem:[%s5629_s1 + $0x468] sm:$0xf]  ;;  %v2597_v54 = vor.u32 %v3579_v44, %v2594_v45  ;;  %v3539_v63 = vld [vmem:[%s5629_s1 + $0x4c] sm:$0xf] }
  0x86   :  { %1455 = vmatmul.bf16.vlgmr.msrb.gmra.mxu3 %v4176_v9  ;;  %v3105_v36 = vor.u32 %v3709_v28, %v3104_v27  ;;  %v3673_v38 = vld [vmem:[%s5629_s1 + $0x474] sm:$0xf0]  ;;  %v3088_v41 = vld [vmem:[%s5629_s1 + $0x568] sm:$0xf]  ;;  %v2418_v13 = vld [vmem:[%s5629_s1 + $0x38] sm:$0xf0] }
  0x87   :  { %1499 = vmatpush.bf16.msra.mxu3 %v3153_v59  ;;  %1480 = vmatpush.bf16.msra.mxu2 %v2785_v0  ;;  %v3705_v42 = vld [vmem:[%s5629_s1 + $0x574] sm:$0xf0]  ;;  %v2961_v46 = vor.u32 %v3673_v38, %v2960_v37  ;;  %v2944_v51 = vld [vmem:[%s5629_s1 + $0x448] sm:$0xf]  ;;  %v3575_v59 = vld [vmem:[%s5629_s1 + $0x16c] sm:$0xf] }
  0x88   :  { %1468 = vmatmul.bf16.vlgmr.msra.gmra.mxu0 %v4135_v53  ;;  %v3089_v50 = vor.u32 %v3705_v42, %v3088_v41  ;;  %v3669_v52 = vld [vmem:[%s5629_s1 + $0x454] sm:$0xf0]  ;;  %v3072_v55 = vld [vmem:[%s5629_s1 + $0x548] sm:$0xf]  ;;  %v2434_v0 = vld [vmem:[%s5629_s1 + $0x58] sm:$0xf0] }
  0x89   :  { %1519 = vmatpush.bf16.msrb.mxu0 %v3169_v4  ;;  %1487 = vmatpush.bf16.msra.mxu1 %v3009_v7  ;;  %v3701_v56 = vld [vmem:[%s5629_s1 + $0x554] sm:$0xf0]  ;;  %v2945_v62 = vor.u32 %v3669_v52, %v2944_v51  ;;  %v2928_v2 = vld [vmem:[%s5629_s1 + $0x428] sm:$0xf]  ;;  %v2581_v4 = vor.u32 %v3575_v59, %v2578_v61  ;;  %v2437_v7 = vor.u32 %v3539_v63, %v2434_v0  ;;  %v2770_v21 = vld [vmem:[%s5629_s1 + $0x2f8] sm:$0xf0] }
  0x8a   :  { %1481 = vmatmul.bf16.vlgmr.msra.gmra.mxu2 %v4148_v60  ;;  %v3073_v1 = vor.u32 %v3701_v56, %v3072_v55  ;;  %v3056_v5 = vld [vmem:[%s5629_s1 + $0x528] sm:$0xf]  ;;  %v3697_v6 = vld [vmem:[%s5629_s1 + $0x534] sm:$0xf0]  ;;  %v3655_v22 = vld [vmem:[%s5629_s1 + $0x3ec] sm:$0xf] }
  0x8b   :  { %1525 = vmatpush.bf16.msrb.mxu2 %v2517_v3  ;;  %1500 = vmatpush.bf16.msra.mxu3 %v3137_v11  ;;  %v3665_v3 = vld [vmem:[%s5629_s1 + $0x434] sm:$0xf0]  ;;  %v3057_v15 = vor.u32 %v3697_v6, %v3056_v5  ;;  %v2898_v24 = vld [vmem:[%s5629_s1 + $0x3f8] sm:$0xf0]  ;;  %v3567_v25 = vld [vmem:[%s5629_s1 + $0x12c] sm:$0xf] }
  0x8c   :  { %v2929_v11 = vor.u32 %v3665_v3, %v2928_v2  ;;  %v3661_v16 = vld [vmem:[%s5629_s1 + $0x414] sm:$0xf0]  ;;  %v3531_v28 = vld [vmem:[%s5629_s1 + $0xc] sm:$0xf]  ;;  %v3026_v33 = vld [vmem:[%s5629_s1 + $0x4f8] sm:$0xf0]  ;;  %v2901_v35 = vor.u32 %v3655_v22, %v2898_v24 }
  0x8d   :  { %1538 = vmatpush.bf16.msra.mxu0 %v2645_v14  ;;  %1488 = vmatpush.bf16.msra.mxu1 %v2993_v20  ;;  %v2912_v14 = vld [vmem:[%s5629_s1 + $0x408] sm:$0xf]  ;;  %v3693_v18 = vld [vmem:[%s5629_s1 + $0x514] sm:$0xf0]  ;;  %v3623_v20 = vld [vmem:[%s5629_s1 + $0x2ec] sm:$0xf] }
  0x8e   :  { %v2913_v27 = vor.u32 %v3661_v16, %v2912_v14  ;;  %v2773_v31 = vor.u32 %v3623_v20, %v2770_v21  ;;  %v3619_v37 = vld [vmem:[%s5629_s1 + $0x2cc] sm:$0xf]  ;;  %v2754_v38 = vld [vmem:[%s5629_s1 + $0x2d8] sm:$0xf0] }
  0x8f   :  { %1526 = vmatpush.bf16.msrb.mxu2 %v2501_v17  ;;  %1501 = vmatpush.bf16.msra.mxu3 %v3121_v23  ;;  %v3040_v17 = vld [vmem:[%s5629_s1 + $0x508] sm:$0xf]  ;;  %v2421_v23 = vor.u32 %v3535_v12, %v2418_v13  ;;  %v2882_v42 = vld [vmem:[%s5629_s1 + $0x3d8] sm:$0xf0]  ;;  %v2757_v49 = vor.u32 %v3619_v37, %v2754_v38  ;;  %v3615_v55 = vld [vmem:[%s5629_s1 + $0x2ac] sm:$0xf] }
  0x90   :  { %v3041_v30 = vor.u32 %v3693_v18, %v3040_v17  ;;  %v2530_v44 = vld [vmem:[%s5629_s1 + $0x118] sm:$0xf0]  ;;  %v3647_v59 = vld [vmem:[%s5629_s1 + $0x3ac] sm:$0xf] }
  0x91   :  { %1539 = vmatpush.bf16.msra.mxu0 %v2629_v26  ;;  %1489 = vmatpush.bf16.msra.mxu1 %v2977_v32  ;;  %v2546_v26 = vld [vmem:[%s5629_s1 + $0x138] sm:$0xf0]  ;;  %v3687_v32 = vld [vmem:[%s5629_s1 + $0x4ec] sm:$0xf] }
  0x92   :  { %v3029_v45 = vor.u32 %v3687_v32, %v3026_v33  ;;  %v3154_v47 = vld [vmem:[%s5629_s1 + $0x5f8] sm:$0xf0]  ;;  %v3715_v63 = vld [vmem:[%s5629_s1 + $0x5cc] sm:$0xf] }
  0x93   :  { %1527 = vmatpush.bf16.msrb.mxu2 %v2485_v29  ;;  %1502 = vmatpush.bf16.msra.mxu3 %v3105_v36  ;;  %v2402_v29 = vld [vmem:[%s5629_s1 + $0x18] sm:$0xf0]  ;;  %v2549_v36 = vor.u32 %v3567_v25, %v2546_v26  ;;  %v3679_v2 = vld [vmem:[%s5629_s1 + $0x4ac] sm:$0xf] }
  0x94   :  { %v2405_v41 = vor.u32 %v3531_v28, %v2402_v29  ;;  %v3010_v51 = vld [vmem:[%s5629_s1 + $0x4d8] sm:$0xf0]  ;;  %v3611_v5 = vld [vmem:[%s5629_s1 + $0x28c] sm:$0xf] }
  0x95   :  { %1540 = vmatpush.bf16.msra.mxu0 %v2613_v40  ;;  %1490 = vmatpush.bf16.msra.mxu1 %v2961_v46  ;;  %v3651_v40 = vld [vmem:[%s5629_s1 + $0x3cc] sm:$0xf]  ;;  %v2738_v56 = vld [vmem:[%s5629_s1 + $0x2b8] sm:$0xf0] }
  0x96   :  { %v3719_v46 = vld [vmem:[%s5629_s1 + $0x5ec] sm:$0xf]  ;;  %v2885_v52 = vor.u32 %v3651_v40, %v2882_v42  ;;  %v2866_v61 = vld [vmem:[%s5629_s1 + $0x3b8] sm:$0xf0] }
  0x97   :  { %1528 = vmatpush.bf16.msrb.mxu2 %v2469_v43  ;;  %1503 = vmatpush.bf16.msra.mxu3 %v3089_v50  ;;  %v3563_v43 = vld [vmem:[%s5629_s1 + $0x10c] sm:$0xf]  ;;  %v3138_v0 = vld [vmem:[%s5629_s1 + $0x5d8] sm:$0xf0] }
  0x98   :  { %3176 = vmatmul.msk.bf16.vlgmr.msrb.gmra.mxu0 %vm1248_vm0, %v4255_v48  ;;  %v3683_v50 = vld [vmem:[%s5629_s1 + $0x4cc] sm:$0xf]  ;;  %v2994_v3 = vld [vmem:[%s5629_s1 + $0x4b8] sm:$0xf0] }
  0x99   :  { %1541 = vmatpush.bf16.msra.mxu0 %v2597_v54  ;;  %1491 = vmatpush.bf16.msra.mxu1 %v2945_v62  ;;  %v2533_v54 = vor.u32 %v3563_v43, %v2530_v44  ;;  %v3013_v62 = vor.u32 %v3683_v50, %v3010_v51  ;;  %v2722_v6 = vld [vmem:[%s5629_s1 + $0x298] sm:$0xf0]  ;;  %v3643_v8 = vld [vmem:[%s5629_s1 + $0x38c] sm:$0xf] }
  0x9a   :  { %v2850_v10 = vld [vmem:[%s5629_s1 + $0x398] sm:$0xf0]  ;;  %v3711_v12 = vld [vmem:[%s5629_s1 + $0x5ac] sm:$0xf]  ;;  %v2725_v14 = vor.u32 %v3611_v5, %v2722_v6  ;;  %v3236_v5 = vld [vmem:[%s5631_s3 + $0x70] sm:$0xf] }
  0x9b   :  { %1529 = vmatpush.bf16.msrb.mxu2 %v2453_v58  ;;  %1504 = vmatpush.bf16.msra.mxu3 %v3073_v1  ;;  %v3157_v58 = vor.u32 %v3719_v46, %v3154_v47  ;;  %v2741_v1 = vor.u32 %v3615_v55, %v2738_v56  ;;  %v3122_v13 = vld [vmem:[%s5629_s1 + $0x5b8] sm:$0xf0]  ;;  %v2853_v16 = vor.u32 %v3643_v8, %v2850_v10  ;;  %v3607_v17 = vld [vmem:[%s5629_s1 + $0x26c] sm:$0xf] }
  0x9c   :  { %v2706_v18 = vld [vmem:[%s5629_s1 + $0x278] sm:$0xf0]  ;;  %v3639_v20 = vld [vmem:[%s5629_s1 + $0x36c] sm:$0xf] }
  0x9d   :  { %1542 = vmatpush.bf16.msra.mxu0 %v2581_v4  ;;  %1492 = vmatpush.bf16.msra.mxu1 %v2929_v11  ;;  %v2869_v4 = vor.u32 %v3647_v59, %v2866_v61  ;;  %v2997_v11 = vor.u32 %v3679_v2, %v2994_v3  ;;  %v3106_v24 = vld [vmem:[%s5629_s1 + $0x598] sm:$0xf0]  ;;  %v2709_v25 = vor.u32 %v3607_v17, %v2706_v18  ;;  %v3671_v26 = vld [vmem:[%s5629_s1 + $0x46c] sm:$0xf] }
  0x9e   :  { %v3603_v29 = vld [vmem:[%s5629_s1 + $0x24c] sm:$0xf]  ;;  %v3090_v38 = vld [vmem:[%s5629_s1 + $0x578] sm:$0xf0] }
  0x9f   :  { %1530 = vmatpush.bf16.msrb.mxu2 %v2437_v7  ;;  %1505 = vmatpush.bf16.msra.mxu3 %v3057_v15  ;;  %v3141_v7 = vor.u32 %v3715_v63, %v3138_v0  ;;  %v3675_v15 = vld [vmem:[%s5629_s1 + $0x48c] sm:$0xf]  ;;  %v2946_v43 = vld [vmem:[%s5629_s1 + $0x458] sm:$0xf0] }
  0xa0   :  { %v3635_v33 = vld [vmem:[%s5629_s1 + $0x34c] sm:$0xf]  ;;  %v2674_v47 = vld [vmem:[%s5629_s1 + $0x238] sm:$0xf0] }
  0xa1   :  { %1543 = vmatpush.bf16.msra.mxu0 %v2565_v19  ;;  %1493 = vmatpush.bf16.msra.mxu1 %v2913_v27  ;;  %v3125_v19 = vor.u32 %v3711_v12, %v3122_v13  ;;  %v2962_v27 = vld [vmem:[%s5629_s1 + $0x478] sm:$0xf0]  ;;  %v3703_v37 = vld [vmem:[%s5629_s1 + $0x56c] sm:$0xf] }
  0xa2   :  { %v3667_v42 = vld [vmem:[%s5629_s1 + $0x44c] sm:$0xf]  ;;  %v2802_v51 = vld [vmem:[%s5629_s1 + $0x338] sm:$0xf0] }
  0xa3   :  { %1531 = vmatpush.bf16.msrb.mxu2 %v2421_v23  ;;  %1506 = vmatpush.bf16.msra.mxu3 %v3041_v30  ;;  %v3707_v23 = vld [vmem:[%s5629_s1 + $0x58c] sm:$0xf]  ;;  %v2690_v30 = vld [vmem:[%s5629_s1 + $0x258] sm:$0xf0] }
  0xa4   :  { %1494 = vmatmul.bf16.vlgmr.msra.gmra.mxu1 %v4343_v34  ;;  %v3599_v46 = vld [vmem:[%s5629_s1 + $0x22c] sm:$0xf]  ;;  %v3074_v56 = vld [vmem:[%s5629_s1 + $0x558] sm:$0xf0] }
  0xa5   :  { %1551 = vmatpush.bf16.msrb.mxu1 %v2773_v31  ;;  %1544 = vmatpush.bf16.msra.mxu0 %v2549_v36  ;;  %v5030_v21 = vpop.f32.mrf.mxu0  ;;  %v3109_v31 = vor.u32 %v3707_v23, %v3106_v24  ;;  %v5050_v32 = vpop.f32.mrf.mxu1  ;;  %v2965_v36 = vor.u32 %v3671_v26, %v2962_v27  ;;  %v3631_v50 = vld [vmem:[%s5629_s1 + $0x32c] sm:$0xf]  ;;  %v2677_v59 = vor.u32 %v3599_v46, %v2674_v47  ;;  %v2786_v3 = vld [vmem:[%s5629_s1 + $0x318] sm:$0xf0]  ;;  %v3228_v26 = vld [vmem:[%s5631_s3 + $0x60] sm:$0xf] }
  0xa6   :  { %1507 = vmatmul.bf16.vlgmr.msra.gmra.mxu3 %v4354_v39  ;;  %v3699_v55 = vld [vmem:[%s5629_s1 + $0x54c] sm:$0xf]  ;;  %v2805_v0 = vor.u32 %v3631_v50, %v2802_v51  ;;  %v3058_v13 = vld [vmem:[%s5629_s1 + $0x538] sm:$0xf0]  ;;  %v3739_v27 = vld [vmem:[%s5631_s3 + $0x64] sm:$0xf0] }
  0xa7   :  { %1564 = vmatpush.bf16.msrb.mxu3 %v2901_v35  ;;  %1532 = vmatpush.bf16.msrb.mxu2 %v2405_v41  ;;  %v2818_v35 = vld [vmem:[%s5629_s1 + $0x358] sm:$0xf0]  ;;  %v2693_v41 = vor.u32 %v3603_v29, %v2690_v30  ;;  %v3663_v61 = vld [vmem:[%s5629_s1 + $0x42c] sm:$0xf]  ;;  %v3276_v50 = vld [vmem:[%s5631_s3 + $0xc0] sm:$0xf] }
  0xa8   :  { %v5064_v40 = vpop.f32.mrf.mxu2  ;;  %v2821_v44 = vor.u32 %v3635_v33, %v2818_v35  ;;  %v3595_v63 = vld [vmem:[%s5629_s1 + $0x20c] sm:$0xf]  ;;  %v3042_v29 = vld [vmem:[%s5629_s1 + $0x518] sm:$0xf0]  ;;  %v3292_v33 = vld [vmem:[%s5631_s3 + $0xe0] sm:$0xf] }
  0xa9   :  { %1552 = vmatpush.bf16.msrb.mxu1 %v2757_v49  ;;  %1545 = vmatpush.bf16.msra.mxu0 %v2533_v54  ;;  %v3093_v49 = vor.u32 %v3703_v37, %v3090_v38  ;;  %v2949_v54 = vor.u32 %v3667_v42, %v2946_v43  ;;  %v3627_v2 = vld [vmem:[%s5629_s1 + $0x30c] sm:$0xf]  ;;  %v3755_v35 = vld [vmem:[%s5631_s3 + $0xe4] sm:$0xf0]  ;;  %v3737_v38 = vld [vmem:[%s5631_s3 + $0x54] sm:$0xf0] }
  0xaa   :  { %1533 = vmatmul.bf16.vlgmr.msrb.gmra.mxu2 %v4146_v57  ;;  %v2978_v57 = vld [vmem:[%s5629_s1 + $0x498] sm:$0xf0]  ;;  %v3723_v6 = vld [vmem:[%s5629_s1 + $0x60c] sm:$0xf]  ;;  %v2789_v18 = vor.u32 %v3627_v2, %v2786_v3  ;;  %v3293_v42 = vor.u32 %v3755_v35, %v3292_v33  ;;  %v3731_v2 = vld [vmem:[%s5631_s3 + $0x24] sm:$0xf0] }
  0xab   :  { %1577 = vmatpush.bf16.msra.mxu2 %v3029_v45  ;;  %1565 = vmatpush.bf16.msrb.mxu3 %v2885_v52  ;;  %v2981_v22 = vor.u32 %v3675_v15, %v2978_v57  ;;  %v5072_v45 = vpop.f32.mrf.mxu3  ;;  %v3695_v12 = vld [vmem:[%s5629_s1 + $0x52c] sm:$0xf]  ;;  %v3260_v3 = vld [vmem:[%s5631_s3 + $0xa0] sm:$0xf] }
  0xac   :  { %1546 = vmatmul.bf16.vlgmr.msra.gmra.mxu0 %v4176_v9  ;;  %v2834_v9 = vld [vmem:[%s5629_s1 + $0x378] sm:$0xf0]  ;;  %v3659_v57 = vld [vmem:[%s5629_s1 + $0x40c] sm:$0xf]  ;;  %v3061_v24 = vor.u32 %v3695_v12, %v3058_v13 }
  0xad   :  { %1590 = vmatpush.bf16.msrb.mxu0 %v3157_v58  ;;  %1553 = vmatpush.bf16.msrb.mxu1 %v2741_v1  ;;  %v2837_v28 = vor.u32 %v3639_v20, %v2834_v9  ;;  %v1263_v52 = vpop.f32.mrf.mxu0  ;;  %v5095_v58 = vld [vmem:[%s5630_s2] sm:$0xf]  ;;  %v2658_v1 = vld [vmem:[%s5629_s1 + $0x218] sm:$0xf0]  ;;  %v1276_v8 = vpop.f32.mrf.mxu1  ;;  %v3300_v9 = vld [vmem:[%s5631_s3 + $0xf0] sm:$0xf] }
  0xae   :  { %v2661_v15 = vor.u32 %v3595_v63, %v2658_v1  ;;  %v236_v17 = vperm.slane %v5095_v58, 0  ;;  %v3196_v1 = vld [vmem:[%s5631_s3 + $0x20] sm:$0xf]  ;;  %v3729_v8 = vld [vmem:[%s5631_s3 + $0x14] sm:$0xf0] }
  0xaf   :  { %1578 = vmatpush.bf16.msra.mxu2 %v3013_v62  ;;  %1566 = vmatpush.bf16.msrb.mxu3 %v2869_v4  ;;  %v2930_v62 = vld [vmem:[%s5629_s1 + $0x438] sm:$0xf0]  ;;  %v3077_v4 = vor.u32 %v3699_v55, %v3074_v56 }
  0xb0   :  { %v2933_v10 = vor.u32 %v3663_v61, %v2930_v62  ;;  %v3749_v62 = vld [vmem:[%s5631_s3 + $0xb4] sm:$0xf0] }
  0xb1   :  { %1591 = vmatpush.bf16.msrb.mxu0 %v3141_v7  ;;  %1554 = vmatpush.bf16.msrb.mxu1 %v2725_v14  ;;  %v3170_v7 = vld [vmem:[%s5629_s1 + $0x618] sm:$0xf0]  ;;  %v1289_v14 = vpop.f32.mrf.mxu2 }
  0xb3   :  { %1579 = vmatpush.bf16.msra.mxu2 %v2997_v11  ;;  %1567 = vmatpush.bf16.msrb.mxu3 %v2853_v16  ;;  %v3741_v11 = vld [vmem:[%s5631_s3 + $0x74] sm:$0xf0]  ;;  %v2914_v16 = vld [vmem:[%s5629_s1 + $0x418] sm:$0xf0]  ;;  %v1302_v20 = vpop.f32.mrf.mxu3 }
  0xb4   :  { %v3237_v23 = vor.u32 %v3741_v11, %v3236_v5  ;;  %v3197_v5 = vor.u32 %v3731_v2, %v3196_v1  ;;  %v3238_v20 = vld [vmem:[%s5631_s3 + $0x78] sm:$0xf0] }
  0xb5   :  { %1592 = vmatpush.bf16.msrb.mxu0 %v3125_v19  ;;  %1555 = vmatpush.bf16.msrb.mxu1 %v2709_v25  ;;  %v3173_v19 = vor.u32 %v3723_v6, %v3170_v7  ;;  %v2917_v25 = vor.u32 %v3659_v57, %v2914_v16  ;;  %v3188_v7 = vld [vmem:[%s5631_s3 + $0x10] sm:$0xf] }
  0xb6   :  { %v3189_v57 = vor.u32 %v3729_v8, %v3188_v7  ;;  %v3769_v7 = vld [vmem:[%s5631_s3 + $0x154] sm:$0xf0]  ;;  %v3730_v8 = vld [vmem:[%s5631_s3 + $0x24] sm:$0xf] }
  0xb7   :  { %1580 = vmatpush.bf16.msra.mxu2 %v2981_v22  ;;  %1568 = vmatpush.bf16.msrb.mxu3 %v2837_v28  ;;  %v3757_v22 = vld [vmem:[%s5631_s3 + $0xf4] sm:$0xf0]  ;;  %v3691_v28 = vld [vmem:[%s5629_s1 + $0x50c] sm:$0xf] }
  0xb8   :  { %v3301_v30 = vor.u32 %v3757_v22, %v3300_v9  ;;  %v3045_v37 = vor.u32 %v3691_v28, %v3042_v29  ;;  %v3244_v22 = vld [vmem:[%s5631_s3 + $0x80] sm:$0xf] }
  0xb9   :  { %1593 = vmatpush.bf16.msrb.mxu0 %v3109_v31  ;;  %1556 = vmatpush.bf16.msrb.mxu1 %v2693_v41  ;;  %v1262_v31 = vadd.f32 %v5030_v21, %v236_v17  ;;  %v3220_v21 = vld [vmem:[%s5631_s3 + $0x50] sm:$0xf]  ;;  %v1339_v41 = vpop.f32.mrf.mxu2  ;;  %v3180_v17 = vld [vmem:[%s5631_s3] sm:$0xf] }
  0xba   :  { %v3221_v46 = vor.u32 %v3737_v38, %v3220_v21  ;;  %v3754_v21 = vld [vmem:[%s5631_s3 + $0xe4] sm:$0xf]  ;;  %v3294_v38 = vld [vmem:[%s5631_s3 + $0xe8] sm:$0xf0] }
  0xbb   :  { %1581 = vmatpush.bf16.msra.mxu2 %v2965_v36  ;;  %1569 = vmatpush.bf16.msrb.mxu3 %v2821_v44  ;;  %v3229_v36 = vor.u32 %v3739_v27, %v3228_v26  ;;  %v1275_v43 = vadd.f32 %v5050_v32, %v1262_v31  ;;  %v3753_v44 = vld [vmem:[%s5631_s3 + $0xd4] sm:$0xf0]  ;;  %v3735_v32 = vld [vmem:[%s5631_s3 + $0x44] sm:$0xf0]  ;;  %v3302_v26 = vld [vmem:[%s5631_s3 + $0xf8] sm:$0xf0] }
  0xbc   :  { %v3230_v31 = vld [vmem:[%s5631_s3 + $0x68] sm:$0xf0] }
  0xbd   :  { %1594 = vmatpush.bf16.msrb.mxu0 %v3093_v49  ;;  %1557 = vmatpush.bf16.msrb.mxu1 %v2677_v59  ;;  %v1288_v49 = vadd.f32 %v5064_v40, %v1275_v43  ;;  %v3733_v40 = vld [vmem:[%s5631_s3 + $0x34] sm:$0xf0]  ;;  %v3736_v43 = vld [vmem:[%s5631_s3 + $0x54] sm:$0xf] }
  0xbf   :  { %1582 = vmatpush.bf16.msra.mxu2 %v2949_v54  ;;  %1570 = vmatpush.bf16.msrb.mxu3 %v2805_v0  ;;  %v3204_v54 = vld [vmem:[%s5631_s3 + $0x30] sm:$0xf]  ;;  %v1301_v61 = vadd.f32 %v5072_v45, %v1288_v49  ;;  %v3773_v49 = vld [vmem:[%s5631_s3 + $0x174] sm:$0xf0] }
  0xc0   :  { %v3205_v63 = vor.u32 %v3733_v40, %v3204_v54 }
  0xc1   :  { %1595 = vmatpush.bf16.msrb.mxu0 %v3077_v4  ;;  %1558 = vmatpush.bf16.msrb.mxu1 %v2661_v15  ;;  %v1313_v52 = vpop.f32.mrf.mxu0  ;;  %v1326_v55 = vpop.f32.mrf.mxu1  ;;  %v3747_v4 = vld [vmem:[%s5631_s3 + $0xa4] sm:$0xf0]  ;;  %v3252_v15 = vld [vmem:[%s5631_s3 + $0x90] sm:$0xf] }
  0xc2   :  { %v1341_v56 = vpop.f32.mrf.mxu2  ;;  %v1314_v0 = vadd.f32 %v1313_v52, %v1301_v61  ;;  %v3261_v13 = vor.u32 %v3747_v4, %v3260_v3  ;;  %v3214_v52 = vld [vmem:[%s5631_s3 + $0x48] sm:$0xf0]  ;;  %v3732_v61 = vld [vmem:[%s5631_s3 + $0x34] sm:$0xf]  ;;  %v3270_v4 = vld [vmem:[%s5631_s3 + $0xb8] sm:$0xf0] }
  0xc3   :  { %1583 = vmatpush.bf16.msra.mxu2 %v2933_v10  ;;  %1571 = vmatpush.bf16.msrb.mxu3 %v2789_v18  ;;  %v3727_v18 = vld [vmem:[%s5631_s3 + $0x4] sm:$0xf0]  ;;  %v3278_v56 = vld [vmem:[%s5631_s3 + $0xc8] sm:$0xf0]  ;;  %v3748_v3 = vld [vmem:[%s5631_s3 + $0xb4] sm:$0xf] }
  0xc4   :  { %1559 = vmatmul.bf16.vlgmr.msrb.gmra.mxu1 %v4135_v53  ;;  %v3284_v53 = vld [vmem:[%s5631_s3 + $0xd0] sm:$0xf]  ;;  %v1327_v6 = vadd.f32 %v1326_v55, %v1314_v0  ;;  %v3750_v55 = vld [vmem:[%s5631_s3 + $0xc4] sm:$0xf] }
  0xc5   :  { %1610 = vmatpush.bf16.msra.mxu1 %v3173_v19  ;;  %1596 = vmatpush.bf16.msrb.mxu0 %v3061_v24  ;;  %v3285_v47 = vor.u32 %v3753_v44, %v3284_v53  ;;  %v3740_v19 = vld [vmem:[%s5631_s3 + $0x74] sm:$0xf]  ;;  %v3181_v24 = vor.u32 %v3727_v18, %v3180_v17  ;;  %v3222_v53 = vld [vmem:[%s5631_s3 + $0x58] sm:$0xf0]  ;;  %v3297_v44 = vor.u32 %v3754_v21, %v3294_v38  ;;  %v3340_v18 = vld [vmem:[%s5631_s3 + $0x140] sm:$0xf] }
  0xc6   :  { %1572 = vmatmul.bf16.vlgmr.msrb.gmra.mxu3 %v4148_v60  ;;  %v3212_v60 = vld [vmem:[%s5631_s3 + $0x40] sm:$0xf]  ;;  %v1340_v16 = vadd.f32 %v1339_v41, %v1327_v6  ;;  %v3241_v28 = vor.u32 %v3740_v19, %v3238_v20  ;;  %v3281_v1 = vor.u32 %v3750_v55, %v3278_v56  ;;  %v3348_v6 = vld [vmem:[%s5631_s3 + $0x150] sm:$0xf]  ;;  %v3190_v17 = vld [vmem:[%s5631_s3 + $0x18] sm:$0xf0] }
  0xc7   :  { %2014 = vmatpush.bf16.msra.mxu3 %v3237_v23  ;;  %1584 = vmatpush.bf16.msra.mxu2 %v2917_v25  ;;  %v3213_v51 = vor.u32 %v3735_v32, %v3212_v60  ;;  %v3743_v23 = vld [vmem:[%s5631_s3 + $0x84] sm:$0xf0]  ;;  %v3756_v25 = vld [vmem:[%s5631_s3 + $0xf4] sm:$0xf] }
  0xc8   :  { %v1616_v27 = vmax.f32 %v1340_v16, 0.0  ;;  %v3245_v33 = vor.u32 %v3743_v23, %v3244_v22  ;;  %v3752_v32 = vld [vmem:[%s5631_s3 + $0xd4] sm:$0xf]  ;;  %v3767_v19 = vld [vmem:[%s5631_s3 + $0x144] sm:$0xf0] }
  0xc9   :  { %2027 = vmatpush.bf16.msrb.mxu1 %v3301_v30  ;;  %1597 = vmatpush.bf16.msrb.mxu0 %v3045_v37  ;;  %v1315_v10 = vpop.f32.mrf.mxu0  ;;  %v1352_v11 = vpop.f32.mrf.mxu3  ;;  %v3738_v30 = vld [vmem:[%s5631_s3 + $0x64] sm:$0xf]  ;;  %v237_v37 = vperm.slane %v5095_v58, 1  ;;  %v3728_v16 = vld [vmem:[%s5631_s3 + $0x14] sm:$0xf]  ;;  %v3341_v23 = vor.u32 %v3767_v19, %v3340_v18 }
  0xca   :  { %1585 = vmatmul.bf16.vlgmr.msra.gmra.mxu2 %v4343_v34  ;;  %v3751_v34 = vld [vmem:[%s5631_s3 + $0xc4] sm:$0xf0]  ;;  %v1328_v12 = vpop.f32.mrf.mxu1  ;;  %v5271_v41 = vpack.c.bf16 %v1616_v27, %v1616_v27  ;;  %v3198_v10 = vld [vmem:[%s5631_s3 + $0x28] sm:$0xf0]  ;;  %v3254_v27 = vld [vmem:[%s5631_s3 + $0x98] sm:$0xf0] }
  0xcb   :  { %2015 = vmatpush.bf16.msra.mxu3 %v3229_v36  ;;  %v3277_v59 = vor.u32 %v3751_v34, %v3276_v50  ;;  %v3305_v36 = vor.u32 %v3756_v25, %v3302_v26  ;;  %v1353_v60 = vadd.f32 %v1352_v11, %v237_v37  ;;  %v3225_v50 = vor.u32 %v3736_v43, %v3222_v53  ;;  %v3744_v26 = vld [vmem:[%s5631_s3 + $0x94] sm:$0xf]  ;;  %v3763_v37 = vld [vmem:[%s5631_s3 + $0x124] sm:$0xf0]  ;;  %v3742_v43 = vld [vmem:[%s5631_s3 + $0x84] sm:$0xf] }
  0xcc   :  { %1598 = vmatmul.bf16.vlgmr.msrb.gmra.mxu0 %v4354_v39  ;;  %v3268_v39 = vld [vmem:[%s5631_s3 + $0xb0] sm:$0xf]  ;;  %v3349_v11 = vor.u32 %v3769_v7, %v3348_v6  ;;  %v3257_v38 = vor.u32 %v3744_v26, %v3254_v27  ;;  %v3246_v53 = vld [vmem:[%s5631_s3 + $0x88] sm:$0xf0]  ;;  %v3759_v55 = vld [vmem:[%s5631_s3 + $0x104] sm:$0xf0] }
  0xcd   :  { %2028 = vmatpush.bf16.msrb.mxu1 %v3293_v42  ;;  %v3269_v45 = vor.u32 %v3749_v62, %v3268_v39  ;;  %v1365_v14 = vpop.f32.mrf.mxu2  ;;  %v3233_v42 = vor.u32 %v3738_v30, %v3230_v31  ;;  %v3206_v39 = vld [vmem:[%s5631_s3 + $0x38] sm:$0xf0]  ;;  %v3356_v62 = vld [vmem:[%s5631_s3 + $0x160] sm:$0xf]  ;;  %v3332_v30 = vld [vmem:[%s5631_s3 + $0x130] sm:$0xf] }
  0xce   :  { %v1366_v40 = vadd.f32 %v1365_v14, %v1353_v60  ;;  %v3765_v31 = vld [vmem:[%s5631_s3 + $0x134] sm:$0xf0]  ;;  %v3316_v60 = vld [vmem:[%s5631_s3 + $0x110] sm:$0xf]  ;;  %v3350_v7 = vld [vmem:[%s5631_s3 + $0x158] sm:$0xf0] }
  0xcf   :  { %2016 = vmatpush.bf16.msra.mxu3 %v3221_v46  ;;  %v3364_v46 = vld [vmem:[%s5631_s3 + $0x170] sm:$0xf]  ;;  %v3764_v18 = vld [vmem:[%s5631_s3 + $0x134] sm:$0xf]  ;;  %v3762_v27 = vld [vmem:[%s5631_s3 + $0x124] sm:$0xf] }
  0xd0   :  { %v3365_v34 = vor.u32 %v3773_v49, %v3364_v46 }
  0xd1   :  { %2029 = vmatpush.bf16.msrb.mxu1 %v3285_v47  ;;  %v1354_v29 = vpop.f32.mrf.mxu3  ;;  %v3286_v47 = vld [vmem:[%s5631_s3 + $0xd8] sm:$0xf0] }
  0xd2   :  { %v3289_v54 = vor.u32 %v3752_v32, %v3286_v47  ;;  %2040 = vmatpush.bf16.msrb.mxu2 %v3365_v34  ;;  %v3726_v29 = vld [vmem:[%s5631_s3 + $0x4] sm:$0xf]  ;;  %v3761_v32 = vld [vmem:[%s5631_s3 + $0x114] sm:$0xf0] }
  0xd3   :  { %2017 = vmatpush.bf16.msra.mxu3 %v3213_v51  ;;  %v3734_v51 = vld [vmem:[%s5631_s3 + $0x44] sm:$0xf] }
  0xd4   :  { %3177 = vmatmul.msk.bf16.vlgmr.msra.gmra.mxu1 %vm1248_vm0, %v4255_v48  ;;  %v3745_v48 = vld [vmem:[%s5631_s3 + $0x94] sm:$0xf0] }
  0xd5   :  { %2030 = vmatpush.bf16.msrb.mxu1 %v3277_v59  ;;  %v3253_v9 = vor.u32 %v3745_v48, %v3252_v15  ;;  %v1367_v35 = vpop.f32.mrf.mxu2  ;;  %v3217_v59 = vor.u32 %v3734_v51, %v3214_v52  ;;  %v3746_v15 = vld [vmem:[%s5631_s3 + $0xa4] sm:$0xf]  ;;  %v3262_v48 = vld [vmem:[%s5631_s3 + $0xa8] sm:$0xf0]  ;;  %v3317_v52 = vor.u32 %v3761_v32, %v3316_v60 }
  0xd6   :  { %v3265_v22 = vor.u32 %v3746_v15, %v3262_v48  ;;  %v3333_v35 = vor.u32 %v3765_v31, %v3332_v30  ;;  %v3342_v15 = vld [vmem:[%s5631_s3 + $0x148] sm:$0xf0]  ;;  %v3396_v30 = vld [vmem:[%s5631_s3 + $0x1b0] sm:$0xf]  ;;  %v3781_v31 = vld [vmem:[%s5631_s3 + $0x1b4] sm:$0xf0] }
  0xd7   :  { %2018 = vmatpush.bf16.msra.mxu3 %v3205_v63  ;;  %v3771_v63 = vld [vmem:[%s5631_s3 + $0x164] sm:$0xf0]  ;;  %v3310_v60 = vld [vmem:[%s5631_s3 + $0x108] sm:$0xf0] }
  0xd8   :  { %v3357_v2 = vor.u32 %v3771_v63, %v3356_v62  ;;  %v3366_v62 = vld [vmem:[%s5631_s3 + $0x178] sm:$0xf0] }
  0xd9   :  { %2031 = vmatpush.bf16.msrb.mxu1 %v3269_v45 }
  0xda   :  { %2041 = vmatpush.bf16.msrb.mxu2 %v3357_v2 }
  0xdb   :  { %2019 = vmatpush.bf16.msra.mxu3 %v3197_v5  ;;  %v3209_v5 = vor.u32 %v3732_v61, %v3206_v39  ;;  %v3772_v39 = vld [vmem:[%s5631_s3 + $0x174] sm:$0xf] }
  0xdc   :  { %v3369_v63 = vor.u32 %v3772_v39, %v3366_v62  ;;  %v3788_v39 = vld [vmem:[%s5631_s3 + $0x1f4] sm:$0xf]  ;;  %v3430_v62 = vld [vmem:[%s5631_s3 + $0x1f8] sm:$0xf0] }
  0xdd   :  { %2032 = vmatpush.bf16.msrb.mxu1 %v3261_v13  ;;  %v3273_v13 = vor.u32 %v3748_v3, %v3270_v4  ;;  %v3789_v3 = vld [vmem:[%s5631_s3 + $0x1f4] sm:$0xf0]  ;;  %v3768_v4 = vld [vmem:[%s5631_s3 + $0x154] sm:$0xf] }
  0xde   :  { %2042 = vmatpush.bf16.msrb.mxu2 %v3349_v11  ;;  %v3787_v11 = vld [vmem:[%s5631_s3 + $0x1e4] sm:$0xf0] }
  0xdf   :  { %2020 = vmatpush.bf16.msra.mxu3 %v3189_v57  ;;  %v3201_v57 = vor.u32 %v3730_v8, %v3198_v10  ;;  %v3353_v8 = vor.u32 %v3768_v4, %v3350_v7  ;;  %v3420_v10 = vld [vmem:[%s5631_s3 + $0x1e0] sm:$0xf] }
  0xe1   :  { %2033 = vmatpush.bf16.msrb.mxu1 %v3253_v9  ;;  %v1378_v0 = vpop.f32.mrf.mxu0  ;;  %v1391_v12 = vpop.f32.mrf.mxu1 }
  0xe2   :  { %v1379_v45 = vadd.f32 %v1378_v0, %v1366_v40  ;;  %2043 = vmatpush.bf16.msrb.mxu2 %v3341_v23  ;;  %v3308_v40 = vld [vmem:[%s5631_s3 + $0x100] sm:$0xf]  ;;  %v3770_v0 = vld [vmem:[%s5631_s3 + $0x164] sm:$0xf] }
  0xe3   :  { %2021 = vmatpush.bf16.msra.mxu3 %v3181_v24 }
  0xe4   :  { %v1392_v14 = vadd.f32 %v1391_v12, %v1379_v45  ;;  %v3428_v45 = vld [vmem:[%s5631_s3 + $0x1f0] sm:$0xf]  ;;  %v3766_v12 = vld [vmem:[%s5631_s3 + $0x144] sm:$0xf] }
  0xe5   :  { %2034 = vmatpush.bf16.msrb.mxu1 %v3245_v33  ;;  %v3182_v33 = vld [vmem:[%s5631_s3 + $0x8] sm:$0xf0]  ;;  %v3429_v6 = vor.u32 %v3789_v3, %v3428_v45  ;;  %v3345_v48 = vor.u32 %v3766_v12, %v3342_v15  ;;  %v3786_v45 = vld [vmem:[%s5631_s3 + $0x1e4] sm:$0xf] }
  0xe6   :  { %2022 = vmatmul.bf16.vlgmr.msra.gmra.mxu3 %v5271_v41  ;;  %2044 = vmatpush.bf16.msrb.mxu2 %v3333_v35  ;;  %v3760_v35 = vld [vmem:[%s5631_s3 + $0x114] sm:$0xf]  ;;  %v3422_v3 = vld [vmem:[%s5631_s3 + $0x1e8] sm:$0xf0] }
  0xe7   :  { %2066 = vmatpush.bf16.msrb.mxu3 %v3241_v28  ;;  %v3193_v28 = vor.u32 %v3728_v16, %v3190_v17  ;;  %2053 = vmatpush.bf16.msra.mxu0 %v3429_v6  ;;  %v3412_v16 = vld [vmem:[%s5631_s3 + $0x1d0] sm:$0xf]  ;;  %v3785_v17 = vld [vmem:[%s5631_s3 + $0x1d4] sm:$0xf0]  ;;  %v3425_v6 = vor.u32 %v3786_v45, %v3422_v3 }
  0xe8   :  { %v3797_v3 = vld [vmem:[%s5633_s5 + $0x38] sm:$0xff] }
  0xe9   :  { %2079 = vmatpush.bf16.msra.mxu1 %v3305_v36  ;;  %v1380_v20 = vpop.f32.mrf.mxu0  ;;  %v1404_v9 = vpop.f32.mrf.mxu3  ;;  %v3324_v36 = vld [vmem:[%s5631_s3 + $0x120] sm:$0xf] }
  0xea   :  { %v1405_v24 = vadd.f32 %v1404_v9, %v1392_v14  ;;  %v1393_v21 = vpop.f32.mrf.mxu1  ;;  %v3325_v46 = vor.u32 %v3763_v37, %v3324_v36  ;;  %v3421_v14 = vor.u32 %v3787_v11, %v3420_v10  ;;  %v3413_v9 = vor.u32 %v3785_v17, %v3412_v16  ;;  %v3318_v36 = vld [vmem:[%s5631_s3 + $0x118] sm:$0xf0]  ;;  %v3784_v10 = vld [vmem:[%s5631_s3 + $0x1d4] sm:$0xf]  ;;  %v3406_v16 = vld [vmem:[%s5631_s3 + $0x1c8] sm:$0xf0] }
  0xeb   :  { %2067 = vmatpush.bf16.msrb.mxu3 %v3233_v42  ;;  %v238_v37 = vperm.slane %v5095_v58, 2  ;;  %v3397_v21 = vor.u32 %v3781_v31, %v3396_v30  ;;  %v3414_v11 = vld [vmem:[%s5631_s3 + $0x1d8] sm:$0xf0] }
  0xec   :  { %2045 = vmatpush.bf16.msrb.mxu2 %v3325_v46  ;;  %2054 = vmatpush.bf16.msra.mxu0 %v3421_v14  ;;  %v3758_v46 = vld [vmem:[%s5631_s3 + $0x104] sm:$0xf] }
  0xed   :  { %2080 = vmatpush.bf16.msra.mxu1 %v3297_v44  ;;  %v1417_v25 = vpop.f32.mrf.mxu2  ;;  %v3185_v44 = vor.u32 %v3726_v29, %v3182_v33 }
  0xee   :  { %v1418_v42 = vadd.f32 %v1417_v25, %v1405_v24  ;;  %v3404_v24 = vld [vmem:[%s5631_s3 + $0x1c0] sm:$0xf]  ;;  %v3783_v25 = vld [vmem:[%s5631_s3 + $0x1c4] sm:$0xf0] }
  0xef   :  { %2068 = vmatpush.bf16.msrb.mxu3 %v3225_v50  ;;  %v3249_v50 = vor.u32 %v3742_v43, %v3246_v53  ;;  %v3405_v26 = vor.u32 %v3783_v25, %v3404_v24  ;;  %v3388_v43 = vld [vmem:[%s5631_s3 + $0x1a0] sm:$0xf]  ;;  %v3779_v53 = vld [vmem:[%s5631_s3 + $0x1a4] sm:$0xf0]  ;;  %v239_v25 = vperm.slane %v5095_v58, 3 }
  0xf0   :  { %2046 = vmatpush.bf16.msrb.mxu2 %v3317_v52  ;;  %2055 = vmatpush.bf16.msra.mxu0 %v3413_v9  ;;  %v3777_v52 = vld [vmem:[%s5631_s3 + $0x194] sm:$0xf0]  ;;  %v3374_v58 = vld [vmem:[%s5631_s3 + $0x188] sm:$0xf0] }
  0xf1   :  { %2081 = vmatpush.bf16.msra.mxu1 %v3289_v54  ;;  %v1430_v47 = vpop.f32.mrf.mxu0  ;;  %v1406_v49 = vpop.f32.mrf.mxu3 }
  0xf2   :  { %v1431_v34 = vadd.f32 %v1430_v47, %v1418_v42  ;;  %v3321_v42 = vor.u32 %v3760_v35, %v3318_v36  ;;  %v3389_v47 = vor.u32 %v3779_v53, %v3388_v43  ;;  %v3313_v49 = vor.u32 %v3758_v46, %v3310_v60 }
  0xf3   :  { %2069 = vmatpush.bf16.msrb.mxu3 %v3217_v59  ;;  %v3309_v59 = vor.u32 %v3759_v55, %v3308_v40 }
  0xf4   :  { %v1617_v54 = vmax.f32 %v1431_v34, 0.0  ;;  %2056 = vmatpush.bf16.msra.mxu0 %v3405_v26  ;;  %v3776_v26 = vld [vmem:[%s5631_s3 + $0x194] sm:$0xf] }
  0xf5   :  { %2082 = vmatpush.bf16.msra.mxu1 %v3281_v1  ;;  %v1419_v51 = vpop.f32.mrf.mxu2  ;;  %2047 = vmatpush.bf16.msrb.mxu2 %v3309_v59  ;;  %v3775_v59 = vld [vmem:[%s5631_s3 + $0x184] sm:$0xf0] }
  0xf6   :  { %v1621_v56 = vpack.c.bf16 %v1617_v54, %v1617_v54  ;;  %v3380_v51 = vld [vmem:[%s5631_s3 + $0x190] sm:$0xf] }
  0xf7   :  { %2070 = vmatpush.bf16.msrb.mxu3 %v3209_v5  ;;  %v3381_v54 = vor.u32 %v3777_v52, %v3380_v51 }
  0xf8   :  { %2035 = vmatmul.bf16.vlgmr.msrb.gmra.mxu1 %v1621_v56  ;;  %2057 = vmatpush.bf16.msra.mxu0 %v3397_v21 }
  0xf9   :  { %2083 = vmatpush.bf16.msra.mxu1 %v3273_v13  ;;  %v1432_v61 = vpop.f32.mrf.mxu0  ;;  %2092 = vmatpush.bf16.msra.mxu2 %v3369_v63 }
  0xfb   :  { %2071 = vmatpush.bf16.msrb.mxu3 %v3201_v57 }
  0xfc   :  { %2058 = vmatpush.bf16.msra.mxu0 %v3389_v47 }
  0xfd   :  { %2084 = vmatpush.bf16.msra.mxu1 %v3265_v22  ;;  %v3334_v22 = vld [vmem:[%s5631_s3 + $0x138] sm:$0xf0] }
  0xfe   :  { %v3337_v23 = vor.u32 %v3764_v18, %v3334_v22  ;;  %v3778_v22 = vld [vmem:[%s5631_s3 + $0x1a4] sm:$0xf] }
  0xff   :  { %2072 = vmatpush.bf16.msrb.mxu3 %v3193_v28  ;;  %v3326_v28 = vld [vmem:[%s5631_s3 + $0x128] sm:$0xf0] }
 0x100   :  { %v3329_v29 = vor.u32 %v3762_v27, %v3326_v28  ;;  %2059 = vmatpush.bf16.msra.mxu0 %v3381_v54  ;;  %v3382_v27 = vld [vmem:[%s5631_s3 + $0x198] sm:$0xf0] }
 0x101   :  { %2085 = vmatpush.bf16.msra.mxu1 %v3257_v38  ;;  %v1443_v5 = vpop.f32.mrf.mxu1  ;;  %v3385_v28 = vor.u32 %v3776_v26, %v3382_v27 }
 0x102   :  { %v1444_v32 = vadd.f32 %v1443_v5, %v238_v37 }
 0x103   :  { %2073 = vmatpush.bf16.msrb.mxu3 %v3185_v44 }
 0x105   :  { %2086 = vmatpush.bf16.msra.mxu1 %v3249_v50  ;;  %v5407_v2 = vpop.f32.mrf.mxu0 }
 0x106   :  { %2074 = vmatmul.bf16.vlgmr.msrb.gmra.mxu3 %v5271_v41  ;;  %v3358_v41 = vld [vmem:[%s5631_s3 + $0x168] sm:$0xf0] }
 0x107   :  { %v3361_v1 = vor.u32 %v3770_v0, %v3358_v41  ;;  %v3433_v0 = vor.u32 %v3788_v39, %v3430_v62  ;;  %2254 = vmatpush.bf16.msra.mxu3 %v3797_v3 }
 0x108   :  { %2087 = vmatmul.bf16.vlgmr.msra.gmra.mxu1 %v1621_v56  ;;  %v3372_v56 = vld [vmem:[%s5631_s3 + $0x180] sm:$0xf] }
 0x109   :  { %2093 = vmatpush.bf16.msra.mxu2 %v3361_v1  ;;  %v1456_v13 = vpop.f32.mrf.mxu3  ;;  %v1445_v20 = vpop.f32.mrf.mxu1  ;;  %v3373_v61 = vor.u32 %v3775_v59, %v3372_v56 }
 0x10a   :  { %v1457_v50 = vadd.f32 %v1456_v13, %v1444_v32  ;;  %v3417_v13 = vor.u32 %v3784_v10, %v3414_v11  ;;  %v3398_v20 = vld [vmem:[%s5631_s3 + $0x1b8] sm:$0xf0]  ;;  %v3792_v10 = vld [vmem:[%s5633_s5 + $0x10] sm:$0xff] }
 0x10b   :  { %2060 = vmatpush.bf16.msra.mxu0 %v3373_v61  ;;  %v3804_v11 = vld [vmem:[%s5633_s5 + $0x70] sm:$0xff] }
 0x10c   :  { %v1470_v40 = vadd.f32 %v5407_v2, %v1457_v50 }
 0x10d   :  { %2094 = vmatpush.bf16.msra.mxu2 %v3353_v8  ;;  %v1471_v57 = vpop.f32.mrf.mxu0  ;;  %v1482_v19 = vpop.f32.mrf.mxu2 }
 0x10e   :  { %v1483_v63 = vadd.f32 %v1482_v19, %v1470_v40  ;;  %v3782_v57 = vld [vmem:[%s5631_s3 + $0x1c4] sm:$0xf]  ;;  %v3780_v19 = vld [vmem:[%s5631_s3 + $0x1b4] sm:$0xf]  ;;  %v1688_v40 = vld [vmem:[%s5632_s4] sm:$0x3] }
 0x10f   :  { %2105 = vmatpush.bf16.msrb.mxu0 %v3433_v0  ;;  %v3409_v17 = vor.u32 %v3782_v57, %v3406_v16  ;;  %v3401_v9 = vor.u32 %v3780_v19, %v3398_v20  ;;  %v3801_v57 = vld [vmem:[%s5633_s5 + $0x58] sm:$0xff]  ;;  %v3800_v16 = vld [vmem:[%s5633_s5 + $0x50] sm:$0xff]  ;;  %v3798_v20 = vld [vmem:[%s5633_s5 + $0x40] sm:$0xff] }
 0x111   :  { %2095 = vmatpush.bf16.msra.mxu2 %v3345_v48  ;;  %v1458_v33 = vpop.f32.mrf.mxu3 }
 0x112   :  { %v3774_v33 = vld [vmem:[%s5631_s3 + $0x184] sm:$0xf] }
 0x113   :  { %2106 = vmatpush.bf16.msrb.mxu0 %v3425_v6  ;;  %v3377_v35 = vor.u32 %v3774_v33, %v3374_v58  ;;  %v3794_v6 = vld [vmem:[%s5633_s5 + $0x20] sm:$0xff] }
 0x115   :  { %2096 = vmatpush.bf16.msra.mxu2 %v3337_v23  ;;  %v1521_v38 = vpop.f32.mrf.mxu0  ;;  %v1484_v44 = vpop.f32.mrf.mxu2  ;;  %v3390_v23 = vld [vmem:[%s5631_s3 + $0x1a8] sm:$0xf0] }
 0x116   :  { %v3393_v24 = vor.u32 %v3778_v22, %v3390_v23  ;;  %v3812_v23 = vld [vmem:[%s5635_s7 + $0x30] sm:$0xff] }
 0x117   :  { %2107 = vmatpush.bf16.msrb.mxu0 %v3417_v13  ;;  %v3803_v13 = vld [vmem:[%s5633_s5 + $0x68] sm:$0xff] }
 0x119   :  { %2097 = vmatpush.bf16.msra.mxu2 %v3329_v29 }
 0x11b   :  { %2108 = vmatpush.bf16.msrb.mxu0 %v3409_v17 }
 0x11d   :  { %2098 = vmatpush.bf16.msra.mxu2 %v3321_v42  ;;  %v1523_v34 = vpop.f32.mrf.mxu0 }
 0x11f   :  { %2109 = vmatpush.bf16.msrb.mxu0 %v3401_v9  ;;  %v3813_v9 = vld [vmem:[%s5635_s7 + $0x38] sm:$0xff] }
 0x121   :  { %2099 = vmatpush.bf16.msra.mxu2 %v3313_v49  ;;  %v1495_v55 = vpop.f32.mrf.mxu1 }
 0x122   :  { %v1496_v41 = vadd.f32 %v1495_v55, %v1483_v63  ;;  %v1690_v55 = vperm.slane %v1688_v40, 0  ;;  %v1691_v63 = vperm.slane %v1688_v40, 1 }
 0x123   :  { %2110 = vmatpush.bf16.msrb.mxu0 %v3393_v24  ;;  %v3811_v24 = vld [vmem:[%s5635_s7 + $0x28] sm:$0xff] }
 0x127   :  { %2111 = vmatpush.bf16.msrb.mxu0 %v3385_v28  ;;  %v3810_v28 = vld [vmem:[%s5635_s7 + $0x20] sm:$0xff] }
 0x129   :  { %v1547_v1 = vpop.f32.mrf.mxu0  ;;  %v1508_v2 = vpop.f32.mrf.mxu3 }
 0x12a   :  { %v1509_v4 = vadd.f32 %v1508_v2, %v1496_v41  ;;  %v1497_v5 = vpop.f32.mrf.mxu1 }
 0x12b   :  { %2112 = vmatpush.bf16.msrb.mxu0 %v3377_v35  ;;  %v3795_v5 = vld [vmem:[%s5633_s5 + $0x28] sm:$0xff] }
 0x12c   :  { %v1522_v7 = vadd.f32 %v1521_v38, %v1509_v4  ;;  %v3796_v4 = vld [vmem:[%s5633_s5 + $0x30] sm:$0xff] }
 0x12d   :  { %v1534_v8 = vpop.f32.mrf.mxu2  ;;  %2255 = vmatpush.bf16.msra.mxu3 %v3796_v4 }
 0x12e   :  { %v1618_v12 = vmax.f32 %v1522_v7, 0.0  ;;  %v1535_v29 = vadd.f32 %v1534_v8, %v239_v25  ;;  %v3805_v7 = vld [vmem:[%s5633_s5 + $0x78] sm:$0xff] }
 0x12f   :  { %v3793_v8 = vld [vmem:[%s5633_s5 + $0x18] sm:$0xff]  ;;  %2267 = vmatpush.bf16.msrb.mxu1 %v3805_v7 }
 0x130   :  { %v1622_v14 = vpack.c.bf16 %v1618_v12, %v1618_v12  ;;  %v1548_v31 = vadd.f32 %v1547_v1, %v1535_v29  ;;  %v3791_v12 = vld [vmem:[%s5633_s5 + $0x8] sm:$0xff] }
 0x131   :  { %v1549_v15 = vpop.f32.mrf.mxu0  ;;  %v1510_v48 = vpop.f32.mrf.mxu3  ;;  %2256 = vmatpush.bf16.msra.mxu3 %v3795_v5 }
 0x132   :  { %2048 = vmatmul.bf16.vlgmr.msrb.gmra.mxu2 %v1622_v14  ;;  %v3790_v15 = vld [vmem:[%s5633_s5] sm:$0xff] }
 0x133   :  { %2268 = vmatpush.bf16.msrb.mxu1 %v3804_v11  ;;  %v3802_v48 = vld [vmem:[%s5633_s5 + $0x60] sm:$0xff]  ;;  %2350 = vmatpush.bf16.msrb.mxu2 %v3813_v9 }
 0x135   :  { %v1536_v18 = vpop.f32.mrf.mxu2  ;;  %2257 = vmatpush.bf16.msra.mxu3 %v3794_v6 }
 0x136   :  { %v3799_v18 = vld [vmem:[%s5633_s5 + $0x48] sm:$0xff] }
 0x137   :  { %2269 = vmatpush.bf16.msrb.mxu1 %v3803_v13  ;;  %2351 = vmatpush.bf16.msrb.mxu2 %v3812_v23 }
 0x139   :  { %2258 = vmatpush.bf16.msra.mxu3 %v3793_v8 }
 0x13b   :  { %2270 = vmatpush.bf16.msrb.mxu1 %v3802_v48  ;;  %2352 = vmatpush.bf16.msrb.mxu2 %v3811_v24 }
 0x13d   :  { %2259 = vmatpush.bf16.msra.mxu3 %v3792_v10 }
 0x13f   :  { %2271 = vmatpush.bf16.msrb.mxu1 %v3801_v57  ;;  %2353 = vmatpush.bf16.msrb.mxu2 %v3810_v28 }
 0x141   :  { %v1560_v30 = vpop.f32.mrf.mxu1  ;;  %2260 = vmatpush.bf16.msra.mxu3 %v3791_v12 }
 0x142   :  { %2100 = vmatmul.bf16.vlgmr.msra.gmra.mxu2 %v1622_v14  ;;  %v1561_v36 = vadd.f32 %v1560_v30, %v1548_v31 }
 0x143   :  { %2272 = vmatpush.bf16.msrb.mxu1 %v3800_v16 }
 0x145   :  { %2261 = vmatpush.bf16.msra.mxu3 %v3790_v15 }
 0x147   :  { %2273 = vmatpush.bf16.msrb.mxu1 %v3799_v18 }
 0x149   :  { %v1573_v37 = vpop.f32.mrf.mxu3  ;;  %v1599_v21 = vpop.f32.mrf.mxu0 }
 0x14a   :  { %v1574_v38 = vadd.f32 %v1573_v37, %v1561_v36  ;;  %v1562_v42 = vpop.f32.mrf.mxu1 }
 0x14b   :  { %2274 = vmatpush.bf16.msrb.mxu1 %v3798_v20  ;;  %v3808_v42 = vld [vmem:[%s5635_s7 + $0x10] sm:$0xff] }
 0x14d   :  { %v1586_v43 = vpop.f32.mrf.mxu2 }
 0x14e   :  { %v1587_v53 = vadd.f32 %v1586_v43, %v1574_v38  ;;  %v3809_v38 = vld [vmem:[%s5635_s7 + $0x18] sm:$0xff]  ;;  %v3807_v43 = vld [vmem:[%s5635_s7 + $0x8] sm:$0xff] }
 0x14f   :  { %2354 = vmatpush.bf16.msrb.mxu2 %v3809_v38 }
 0x150   :  { %v1600_v60 = vadd.f32 %v1599_v21, %v1587_v53  ;;  %v3806_v53 = vld [vmem:[%s5635_s7] sm:$0xff] }
 0x151   :  { %v1575_v44 = vpop.f32.mrf.mxu3  ;;  %v1601_v46 = vpop.f32.mrf.mxu0 }
 0x152   :  { %v1612_v32 = vpop.f32.mrf.mxu1  ;;  %v3815_v46 = vld [vmem:[%s5634_s6] ss:$0 sm:$0xff]  ;;  %s3847_s6 = smov [#allocation2]  }
 0x153   :  { %v1613_v47 = vadd.f32 %v1612_v32, %v1600_v60  ;;  %2355 = vmatpush.bf16.msrb.mxu2 %v3808_v42  ;;  %s2379_s7 = sshll.u32 %s3847_s6, 4  ;;  %s2380_s7 = int_to_ptr.vmem [resolvable:$true] %s2379_s7 }
 0x155   :  { %v1588_v49 = vpop.f32.mrf.mxu2  ;;  %v1619_v50 = vmax.f32 %v1613_v47, 0.0 }
 0x157   :  { %v1623_v34 = vpack.c.bf16 %v1619_v50, %v1619_v50  ;;  %2356 = vmatpush.bf16.msrb.mxu2 %v3807_v43 }
 0x159   :  { %2061 = vmatmul.bf16.vlgmr.msra.gmra.mxu0 %v1623_v34 }
 0x15a   :  { %v1614_v51 = vpop.f32.mrf.mxu1 }
 0x15b   :  { %2357 = vmatpush.bf16.msrb.mxu2 %v3806_v53 }
 0x169   :  { %v2023_v52 = vpop.f32.mrf.mxu3  ;;  %2113 = vmatmul.bf16.vlgmr.msrb.gmra.mxu0 %v1623_v34 }
 0x16a   :  { %v2024_v56 = vadd.f32 %v2023_v52, %v1690_v55  ;;  %v3816_v52 = vld [vmem:[%s5636_s8] ss:$0 sm:$0xff] }
 0x171   :  { %v2025_v54 = vpop.f32.mrf.mxu3 }
 0x175   :  { %v2036_v59 = vpop.f32.mrf.mxu1 }
 0x176   :  { %v2037_v61 = vadd.f32 %v2036_v59, %v2024_v56 }
 0x17d   :  { %v2038_v62 = vpop.f32.mrf.mxu1 }
 0x185   :  { %v2088_v1 = vpop.f32.mrf.mxu1 }
 0x189   :  { %v2075_v39 = vpop.f32.mrf.mxu3 }
 0x18a   :  { %v2076_v41 = vadd.f32 %v2075_v39, %v1691_v63 }
 0x18c   :  { %v2089_v2 = vadd.f32 %v2088_v1, %v2076_v41 }
 0x18d   :  { %v2090_v45 = vpop.f32.mrf.mxu1 }
 0x191   :  { %v2077_v0 = vpop.f32.mrf.mxu3 }
 0x1b5   :  { %v2049_v14 = vpop.f32.mrf.mxu2 }
 0x1b6   :  { %v2050_v25 = vadd.f32 %v2049_v14, %v2037_v61 }
 0x1bd   :  { %v2051_v17 = vpop.f32.mrf.mxu2 }
 0x1c5   :  { %v2101_v19 = vpop.f32.mrf.mxu2 }
 0x1c6   :  { %v2102_v33 = vadd.f32 %v2101_v19, %v2089_v2 }
 0x1cd   :  { %v2103_v22 = vpop.f32.mrf.mxu2 }
 0x1d6   :  { %v2062_v26 = vpop.f32.mrf.mxu0 }
 0x1d7   :  { %v2063_v27 = vadd.f32 %v2062_v26, %v2050_v25 }
 0x1d9   :  { %v2118_v29 = vmax.f32 %v2063_v27, 0.0 }
 0x1db   :  { %v2120_v30 = vpack.c.bf16 %v2118_v29, %v2118_v29 }
 0x1dd   :  { %2262 = vmatmul.bf16.vlgmr.msra.gmra.mxu3 %v2120_v30 }
 0x1de   :  { %v2064_v31 = vpop.f32.mrf.mxu0 }
 0x1e6   :  { %v2114_v58 = vpop.f32.mrf.mxu0 }
 0x1e7   :  { %v2115_v35 = vadd.f32 %v2114_v58, %v2102_v33 }
 0x1e9   :  { %v2119_v36 = vmax.f32 %v2115_v35, 0.0 }
 0x1eb   :  { %v2121_v37 = vpack.c.bf16 %v2119_v36, %v2119_v36 }
 0x1ed   :  { %2275 = vmatmul.bf16.vlgmr.msrb.gmra.mxu1 %v2121_v37 }
 0x1ee   :  { %v2116_v21 = vpop.f32.mrf.mxu0 }
 0x260   :  { %v2263_v44 = vpop.f32.mrf.mxu3 }
 0x261   :  { %v2264_v32 = vadd.f32 %v3815_v46, %v2263_v44 }
 0x268   :  { %v2265_v60 = vpop.f32.mrf.mxu3 }
 0x26a   :  { %v2276_v47 = vpop.f32.mrf.mxu1 }
 0x26b   :  { %v2277_v49 = vadd.f32 %v2276_v47, %v2264_v32 }
 0x26d   :  { %v2280_v50 = vmax.f32 %v2277_v49, 0.0 }
 0x26f   :  { %v2281_v34 = vpack.c.bf16 %v2280_v50, %v2280_v50 }
 0x271   :  { %2358 = vmatmul.bf16.vlgmr.msrb.gmra.mxu2 %v2281_v34 }
 0x272   :  { %v2278_v51 = vpop.f32.mrf.mxu1 }
 0x2f4   :  { %v2359_v54 = vpop.f32.mrf.mxu2 }
 0x2f5   :  { %v2360_v40 = vadd.f32 %v3816_v52, %v2359_v54 }
 0x2f7   :  { %2363 = vmax.xlane.f32.xlu0 %v2360_v40 }
 0x2fc   :  { %v2361_v55 = vpop.f32.mrf.mxu2 }
 0x36a   :  { %v2364_v56 = vpop.xlane.xlu0 %2363 }
 0x36b   :  { %v2365_v59 = vsub.f32 %v2360_v40, %v2364_v56 }
 0x36d   :  { %v2366_v61 = vmul.f32 1.442695, %v2365_v59 }
 0x36f   :  { %3817 = vpow2.f32 %v2366_v61 }
 0x375   :  { %v3818_v39 = vpop.eup %3817 }
 0x376   :  { %2368 = vadd.xlane.f32.xlu0 %v3818_v39 }
 0x3e9   :  { %v2369_v62 = vpop.xlane.xlu0 %2368 }
 0x3ea   :  { %3819 = vlog2.f32 %v2369_v62 }
 0x3f0   :  { %v3820_v63 = vpop.eup %3819 }
 0x3f1   :  { %v2371_v0 = vmul.f32 0.6931472, %v3820_v63 }
 0x3f3   :  { %v2372_v41 = vsub.f32 %v2365_v59, %v2371_v0 }
 0x3f5   :  { %2373 = vst [vmem:[#allocation2] sm:$0xff] %v2372_v41 }
 0x3f6   :  { %2384 = dma.vmem_to_hbm [thread:$0]  %s2380_s7, 128, %s2382_s16, [#allocation3]  }
 0x3f7   :  { %3845 = dma.done.wait [#allocation3], 128  }
 0x3f8   :  { %3846 = vsyncadd [#allocation3], 4294967168 }
 0x3f9   :  { %2389 = vsyncpa [#allocation3], 1 }

</bundles_post_ra>
